<compile_context>
chip_gen: v5e
topology: v5e:2x2
jax: 0.10.0
libtpu: 0.0.40
codegen_flags: <defaults>
</compile_context>

<pallas_src>
import functools
import math

import numpy as np
import jax
import jax.numpy as jnp
from jax import lax
from jax.experimental import pallas as pl
from jax.experimental.pallas import tpu as pltpu


# --------------------------------------------------------------------------------------
# Fused Pallas kernel (everything for one batch element)
# --------------------------------------------------------------------------------------

def _att_model_kernel(src_ref, dct_ref, idct_ref, rep_ref, eyet_ref,
                      wq1_ref, wq2_ref, wk1_ref, wk2_ref,
                      ain_ref, wina_ref, winb_ref, a_ref, w_ref, aout_ref, wout_ref,
                      out_ref,
                      *, kernel_size, output_n, k1, k2, n_layer, num_stage, lamda, alpha):
    """Fused forward for one batch element.

    src_ref : (1, input_n, feat)            raw input sequence
    dct_ref : (dct_n, vl)    idct_ref: (vl, dct_n)
    rep_ref : (vn, vn*vl)    eyet_ref: (vl, vn*vl)   static selector matrices (see wrapper)
    w*1_ref : (k1*feat, dm)  w*2_ref : (k2*dm, dm)   im2col-folded conv weights (bf16)
    ain/aout: (S, N, N)      wina/winb: (S, dct_n, H)  a:(S,L,N,N)  w:(S,L,H,H)
    wout    : (S, H, dct_n)  (pre-sliced output projection)
    out_ref : (1, feat, S*vl)
    """
    f32, bf16 = jnp.float32, jnp.bfloat16

    src = src_ref[0].astype(f32)                       # (input_n, feat)
    input_n, feat = src.shape
    dct = dct_ref[...].astype(f32)                     # (dct_n, vl)
    idct = idct_ref[...].astype(f32)                   # (vl, dct_n)
    dct_n, vl = dct.shape
    vn = rep_ref.shape[0]

    # ---- convQ / convK: im2col -> one matmul per conv layer (bf16 operands, f32 acc) ----
    def conv_chain(x, w1_ref, w2_ref):                 # x: (L, feat) f32
        l1 = x.shape[0] - k1 + 1
        xc1 = jnp.concatenate([x[t:t + l1, :] for t in range(k1)], axis=1)      # (l1, k1*feat)
        h1 = jnp.maximum(jnp.dot(xc1.astype(bf16), w1_ref[...],
                                 preferred_element_type=f32), 0.0)               # (l1, dm)
        l2 = l1 - k2 + 1
        xc2 = jnp.concatenate([h1[t:t + l2, :] for t in range(k2)], axis=1)      # (l2, k2*dm)
        return jnp.maximum(jnp.dot(xc2.astype(bf16), w2_ref[...],
                                   preferred_element_type=f32), 0.0)             # (l2, dm)

    x_key = src[:input_n - output_n, :] * 1e-3          # (Lk, feat), /1000 as in reference
    x_query = src[input_n - kernel_size:, :] * 1e-3     # (kernel_size, feat)
    k_feat = conv_chain(x_key, wk1_ref, wk2_ref)         # (vn, dm)
    q_feat = conv_chain(x_query, wq1_ref, wq2_ref)       # (1, dm)

    # ---- attention scores (exact division to match reference) ----
    s = lax.dot_general(q_feat, k_feat, (((1,), (1,)), ((), ())),
                        preferred_element_type=f32) + 1e-15                      # (1, vn)
    att = s / jnp.sum(s, axis=1, keepdims=True)                                  # (1, vn)

    # ---- attention-weighted value (linearity of DCT: weight raw windows, then one DCT) ----
    # win_tall row (i*vl + t) = src[i + t, :]   (all vn sliding windows stacked on sublanes)
    win_tall = jnp.concatenate([src[i:i + vl, :] for i in range(vn)], axis=0)    # (vn*vl, feat)
    # a_kron[t, i*vl + t'] = att_i * delta(t, t')  -> weighted_win = sum_i att_i * window_i
    att_expand = jnp.dot(att, rep_ref[...], preferred_element_type=f32)          # (1, vn*vl)
    a_kron = eyet_ref[...] * att_expand                                          # (vl, vn*vl)
    weighted_win = jnp.dot(a_kron, win_tall, preferred_element_type=f32)         # (vl, feat)
    # dct_att[f, c] = sum_t weighted_win[t, f] * dct[c, t]   (== reference att @ V, reshaped)
    dct_att = lax.dot_general(weighted_win, dct, (((0,), (1,)), ((), ())),
                              preferred_element_type=f32)                        # (feat, dct_n)

    # ---- GCN input DCT (last kernel_size frames + last frame repeated output_n times) ----
    ingcn = jnp.concatenate(
        [src[input_n - kernel_size:, :],
         jnp.broadcast_to(src[input_n - 1:input_n, :], (output_n, feat))], axis=0)   # (vl, feat)
    dct_in = lax.dot_general(ingcn, dct, (((0,), (1,)), ((), ())),
                             preferred_element_type=f32)                         # (feat, dct_n)

    # ---- GCN stages (GCNII-style stand-in) + per-stage IDCT; weights stay VMEM-resident ----
    # TODO(synk): GCN.GCN source is not provided; this GCNII-style block matches shapes and
    # the (x)->(out, his)/(x, his)->(out, his) signature but not the exact reference weights.
    dct_att_b = dct_att.astype(bf16)
    his = None
    stage_outs = []
    for st in range(num_stage):
        ain = ain_ref[st]                                                         # (N, N) bf16
        # h0 = tanh(A_in @ [dct_in | dct_att] @ W_in)  with W_in pre-split into two halves
        h0 = jnp.tanh(
            jnp.dot(jnp.dot(ain, dct_in.astype(bf16),
                            preferred_element_type=f32).astype(bf16),
                    wina_ref[st], preferred_element_type=f32)
            + jnp.dot(jnp.dot(ain, dct_att_b,
                              preferred_element_type=f32).astype(bf16),
                      winb_ref[st], preferred_element_type=f32))                  # (N, H) f32
        if his is not None:
            h0 = h0 + his
        h = h0

        for l in range(1, n_layer + 1):                                           # static unroll
            beta = math.log(lamda / l + 1.0)
            support = ((1.0 - alpha) * jnp.dot(a_ref[st, l - 1], h.astype(bf16),
                                               preferred_element_type=f32)
                       + alpha * h0)
            h = jnp.tanh((1.0 - beta) * support
                         + beta * jnp.dot(support.astype(bf16), w_ref[st, l - 1],
                                          preferred_element_type=f32))

        # output projection pre-sliced to the dct_n columns actually used; +dct_in residual
        dct_out = jnp.dot(jnp.dot(aout_ref[st], h.astype(bf16),
                                  preferred_element_type=f32).astype(bf16),
                          wout_ref[st], preferred_element_type=f32) + dct_in      # (N, dct_n)

        # IDCT (f32), produced lane-major as (feat, vl) so all stages form one dense slab
        stage_outs.append(lax.dot_general(dct_out, idct, (((1,), (1,)), ((), ())),
                                          preferred_element_type=f32))            # (feat, vl)
        his = h0
        dct_in = dct_out

    out_ref[0] = jnp.concatenate(stage_outs, axis=1).astype(out_ref.dtype)        # (feat, S*vl)


# --------------------------------------------------------------------------------------
# Wrapper
# --------------------------------------------------------------------------------------

def att_model_forward(params, consts, src, *, kernel_size, n_layer, num_stage, dct_n,
                      lamda, alpha, output_n=10, input_n=30, itera=1):
    assert itera == 1   # TODO(synk): itera>1 autoregressive extension branch not implemented.
    assert kernel_size == 10
    src = src[:, :input_n]                               # (bs, input_n, feat)
    bs, _, feat = src.shape
    vl = kernel_size + output_n
    vn = input_n - kernel_size - output_n + 1

    dm = params["convQ_w1"].shape[1]
    k1 = params["convQ_w1"].shape[0] // feat
    k2 = params["convQ_w2"].shape[0] // dm
    S, L, N = num_stage, n_layer, feat
    H = params["gcn_W"].shape[-1]

    kernel = functools.partial(
        _att_model_kernel, kernel_size=kernel_size, output_n=output_n, k1=k1, k2=k2,
        n_layer=n_layer, num_stage=num_stage, lamda=float(lamda), alpha=float(alpha))

    out_all = pl.pallas_call(
        kernel,
        grid=(bs,),
        in_specs=[
            pl.BlockSpec((1, input_n, feat), lambda b: (b, 0, 0)),        # src (per batch)
            pl.BlockSpec((dct_n, vl), lambda b: (0, 0)),                  # dct_sub
            pl.BlockSpec((vl, dct_n), lambda b: (0, 0)),                  # idct_sub
            pl.BlockSpec((vn, vn * vl), lambda b: (0, 0)),                # rep_mat
            pl.BlockSpec((vl, vn * vl), lambda b: (0, 0)),                # eye_tile
            pl.BlockSpec((k1 * feat, dm), lambda b: (0, 0)),              # convQ_w1
            pl.BlockSpec((k2 * dm, dm), lambda b: (0, 0)),                # convQ_w2
            pl.BlockSpec((k1 * feat, dm), lambda b: (0, 0)),              # convK_w1
            pl.BlockSpec((k2 * dm, dm), lambda b: (0, 0)),                # convK_w2
            pl.BlockSpec((S, N, N), lambda b: (0, 0, 0)),                 # gcn_A_in
            pl.BlockSpec((S, dct_n, H), lambda b: (0, 0, 0)),             # gcn_W_in_a
            pl.BlockSpec((S, dct_n, H), lambda b: (0, 0, 0)),             # gcn_W_in_b
            pl.BlockSpec((S, L, N, N), lambda b: (0, 0, 0, 0)),           # gcn_A
            pl.BlockSpec((S, L, H, H), lambda b: (0, 0, 0, 0)),           # gcn_W
            pl.BlockSpec((S, N, N), lambda b: (0, 0, 0)),                 # gcn_A_out
            pl.BlockSpec((S, H, dct_n), lambda b: (0, 0, 0)),             # gcn_W_out (sliced)
        ],
        out_specs=pl.BlockSpec((1, feat, S * vl), lambda b: (b, 0, 0)),
        out_shape=jax.ShapeDtypeStruct((bs, feat, S * vl), jnp.float32),
        compiler_params=pltpu.CompilerParams(dimension_semantics=("parallel",)),
    )(src, consts["dct_sub"], consts["idct_sub"], consts["rep_mat"], consts["eye_tile"],
      params["convQ_w1"], params["convQ_w2"], params["convK_w1"], params["convK_w2"],
      params["gcn_A_in"], params["gcn_W_in_a"], params["gcn_W_in_b"],
      params["gcn_A"], params["gcn_W"], params["gcn_A_out"], params["gcn_W_out"])

    # per-stage outputs, unsqueeze(2) as in the reference (itera axis) -> (bs, vl, 1, feat)
    outs = []
    for j in range(num_stage):
        o = out_all[:, :, j * vl:(j + 1) * vl]                 # (bs, feat, vl)
        outs.append(jnp.transpose(o, (0, 2, 1))[:, :, None, :])
    return outs


# --------------------------------------------------------------------------------------
# Constants / parameters
# --------------------------------------------------------------------------------------

def get_dct_matrix(N):
    dct_m = np.eye(N)
    for k in range(N):
        for i in range(N):
            w = np.sqrt(2.0 / N)
            if k == 0:
                w = np.sqrt(1.0 / N)
            dct_m[k, i] = w * np.cos(np.pi * (i + 0.5) * k / N)
    idct_m = np.linalg.inv(dct_m)
    return dct_m, idct_m


def build_constants(*, kernel_size, output_n, input_n, dct_n):
    vl = kernel_size + output_n
    vn = input_n - kernel_size - output_n + 1
    dct_m, idct_m = get_dct_matrix(vl)
    # rep_mat[i, i*vl + t] = 1  (broadcast att_i across its window slot)
    rep = np.kron(np.eye(vn, dtype=np.float32), np.ones((1, vl), np.float32))
    # eye_tile[t, i*vl + t'] = delta(t, t')  (selects frame t from every window)
    eyet = np.tile(np.eye(vl, dtype=np.float32), (1, vn))
    return {
        "dct_sub": jnp.asarray(dct_m[:dct_n], jnp.float32),        # (dct_n, vl)
        "idct_sub": jnp.asarray(idct_m[:, :dct_n], jnp.float32),   # (vl, dct_n)
        "rep_mat": jnp.asarray(rep, jnp.float32),                  # (vn, vn*vl)
        "eye_tile": jnp.asarray(eyet, jnp.float32),                # (vl, vn*vl)
    }


def init_params(key, *, in_features, d_model, n_layer, num_stage, dct_n):
    """Synthetic weights.

    Conv weights are stored pre-folded for im2col: (k*Cin, Cout), equivalent to a PyTorch
    Conv1d weight (Cout, Cin, k) via transpose(2, 1, 0).reshape(k*Cin, Cout).
    GCN weights are a GCNII-style stand-in, stacked over stages/layers, with W_in pre-split
    into dct_in / dct_att halves and W_out pre-sliced to the dct_n columns actually used.
    MXU operands are stored in bf16 (f32 accumulation happens in-kernel).
    """
    node_n = in_features
    hidden = d_model
    kit = iter(jax.random.split(key, 16))

    def nrm(shape, scale):
        return (jax.random.normal(next(kit), shape, jnp.float32) * scale).astype(jnp.bfloat16)

    eye = jnp.eye(node_n, dtype=jnp.float32)
    return {
        "convQ_w1": nrm((6 * in_features, d_model), 1.0 / math.sqrt(in_features * 6)),
        "convQ_w2": nrm((5 * d_model, d_model), 1.0 / math.sqrt(d_model * 5)),
        "convK_w1": nrm((6 * in_features, d_model), 1.0 / math.sqrt(in_features * 6)),
        "convK_w2": nrm((5 * d_model, d_model), 1.0 / math.sqrt(d_model * 5)),
        "gcn_A_in": (eye[None] + jax.random.normal(next(kit), (num_stage, node_n, node_n),
                                                   jnp.float32) * 0.05).astype(jnp.bfloat16),
        "gcn_W_in_a": nrm((num_stage, dct_n, hidden), 1.0 / math.sqrt(2 * dct_n)),
        "gcn_W_in_b": nrm((num_stage, dct_n, hidden), 1.0 / math.sqrt(2 * dct_n)),
        "gcn_A": (eye[None, None] + jax.random.normal(next(kit),
                                                      (num_stage, n_layer, node_n, node_n),
                                                      jnp.float32) * 0.05).astype(jnp.bfloat16),
        "gcn_W": nrm((num_stage, n_layer, hidden, hidden), 1.0 / math.sqrt(hidden)),
        "gcn_A_out": (eye[None] + jax.random.normal(next(kit), (num_stage, node_n, node_n),
                                                    jnp.float32) * 0.05).astype(jnp.bfloat16),
        "gcn_W_out": nrm((num_stage, hidden, dct_n), 1.0 / math.sqrt(hidden)),
    }


# --------------------------------------------------------------------------------------
# Main
# --------------------------------------------------------------------------------------

if __name__ == "__main__":
    # Small, forward-consistent hyperparameters.
    in_features = 16
    kernel_size = 10          # asserted == 10 in the reference module
    d_model = 32
    n_layer = 2
    num_stage = 3
    dct_n = 10
    lamda = 0.5
    alpha = 0.1
    input_n = 30
    output_n = 10
    bs = 2
    seq_len = 35

    key = jax.random.PRNGKey(0)
    pkey, xkey = jax.random.split(key)
    params = init_params(pkey, in_features=in_features, d_model=d_model,
                         n_layer=n_layer, num_stage=num_stage, dct_n=dct_n)
    consts = build_constants(kernel_size=kernel_size, output_n=output_n,
                             input_n=input_n, dct_n=dct_n)
    src = jax.random.normal(xkey, (bs, seq_len, in_features), jnp.float32) * 100.0

    fwd = jax.jit(functools.partial(
        att_model_forward, kernel_size=kernel_size, n_layer=n_layer, num_stage=num_stage,
        dct_n=dct_n, lamda=lamda, alpha=alpha, output_n=output_n, input_n=input_n, itera=1))

    outs = fwd(params, consts, src)
    outs = [jax.block_until_ready(o) for o in outs]

    expected = (bs, kernel_size + output_n, 1, in_features)
    assert len(outs) == num_stage
    for o in outs:
        assert o.shape == expected, (o.shape, expected)
        assert bool(jnp.all(jnp.isfinite(o)))
    print("KERNEL_OK")
</pallas_src>

<mosaic_0001>
module attributes {stable_mosaic.version = 11 : i64} {
  func.func @_att_model_kernel(%arg0: i32, %arg1: memref<1x30x16xf32, #tpu.memory_space<vmem>>, %arg2: memref<10x20xf32, #tpu.memory_space<vmem>>, %arg3: memref<20x10xf32, #tpu.memory_space<vmem>>, %arg4: memref<11x220xf32, #tpu.memory_space<vmem>>, %arg5: memref<20x220xf32, #tpu.memory_space<vmem>>, %arg6: memref<96x32xbf16, #tpu.memory_space<vmem>>, %arg7: memref<160x32xbf16, #tpu.memory_space<vmem>>, %arg8: memref<96x32xbf16, #tpu.memory_space<vmem>>, %arg9: memref<160x32xbf16, #tpu.memory_space<vmem>>, %arg10: memref<3x16x16xbf16, #tpu.memory_space<vmem>>, %arg11: memref<3x10x32xbf16, #tpu.memory_space<vmem>>, %arg12: memref<3x10x32xbf16, #tpu.memory_space<vmem>>, %arg13: memref<3x2x16x16xbf16, #tpu.memory_space<vmem>>, %arg14: memref<3x2x32x32xbf16, #tpu.memory_space<vmem>>, %arg15: memref<3x16x16xbf16, #tpu.memory_space<vmem>>, %arg16: memref<3x32x10xbf16, #tpu.memory_space<vmem>>, %arg17: memref<1x16x60xf32, #tpu.memory_space<vmem>>) attributes {dimension_semantics = [#tpu.dimension_semantics<parallel>], iteration_bounds = array<i64: 2>, scalar_prefetch = 0 : i64, scratch_operands = 0 : i64, tpu.core_type = #tpu.core_type<tc>, window_params = [{transform_indices = @transform_0, window_bounds = array<i64: 1, 30, 16>}, {pipeline_mode = #tpu.pipeline_mode<synchronous>, transform_indices = @transform_1, window_bounds = array<i64: 10, 20>}, {pipeline_mode = #tpu.pipeline_mode<synchronous>, transform_indices = @transform_2, window_bounds = array<i64: 20, 10>}, {pipeline_mode = #tpu.pipeline_mode<synchronous>, transform_indices = @transform_3, window_bounds = array<i64: 11, 220>}, {pipeline_mode = #tpu.pipeline_mode<synchronous>, transform_indices = @transform_4, window_bounds = array<i64: 20, 220>}, {pipeline_mode = #tpu.pipeline_mode<synchronous>, transform_indices = @transform_5, window_bounds = array<i64: 96, 32>}, {pipeline_mode = #tpu.pipeline_mode<synchronous>, transform_indices = @transform_6, window_bounds = array<i64: 160, 32>}, {pipeline_mode = #tpu.pipeline_mode<synchronous>, transform_indices = @transform_7, window_bounds = array<i64: 96, 32>}, {pipeline_mode = #tpu.pipeline_mode<synchronous>, transform_indices = @transform_8, window_bounds = array<i64: 160, 32>}, {pipeline_mode = #tpu.pipeline_mode<synchronous>, transform_indices = @transform_9, window_bounds = array<i64: 3, 16, 16>}, {pipeline_mode = #tpu.pipeline_mode<synchronous>, transform_indices = @transform_10, window_bounds = array<i64: 3, 10, 32>}, {pipeline_mode = #tpu.pipeline_mode<synchronous>, transform_indices = @transform_11, window_bounds = array<i64: 3, 10, 32>}, {pipeline_mode = #tpu.pipeline_mode<synchronous>, transform_indices = @transform_12, window_bounds = array<i64: 3, 2, 16, 16>}, {pipeline_mode = #tpu.pipeline_mode<synchronous>, transform_indices = @transform_13, window_bounds = array<i64: 3, 2, 32, 32>}, {pipeline_mode = #tpu.pipeline_mode<synchronous>, transform_indices = @transform_14, window_bounds = array<i64: 3, 16, 16>}, {pipeline_mode = #tpu.pipeline_mode<synchronous>, transform_indices = @transform_15, window_bounds = array<i64: 3, 32, 10>}, {transform_indices = @transform_16, window_bounds = array<i64: 1, 16, 60>}]} {
    %c0 = arith.constant 0 : index
    %c0_0 = arith.constant 0 : index
    %c0_1 = arith.constant 0 : index
    %0 = vector.load %arg1[%c0, %c0_0, %c0_1] : memref<1x30x16xf32, #tpu.memory_space<vmem>>, vector<1x30x16xf32>
    %1 = vector.shape_cast %0 : vector<1x30x16xf32> to vector<30x16xf32>
    %c0_2 = arith.constant 0 : index
    %c0_3 = arith.constant 0 : index
    %2 = vector.load %arg2[%c0_2, %c0_3] : memref<10x20xf32, #tpu.memory_space<vmem>>, vector<10x20xf32>
    %c0_4 = arith.constant 0 : index
    %c0_5 = arith.constant 0 : index
    %3 = vector.load %arg3[%c0_4, %c0_5] : memref<20x10xf32, #tpu.memory_space<vmem>>, vector<20x10xf32>
    %4 = vector.extract_strided_slice %1 {offsets = [0, 0], sizes = [20, 16], strides = [1, 1]} : vector<30x16xf32> to vector<20x16xf32>
    %cst = arith.constant 1.000000e-03 : f32
    %5 = vector.broadcast %cst : f32 to vector<20x16xf32>
    %6 = arith.mulf %4, %5 : vector<20x16xf32>
    %7 = vector.extract_strided_slice %1 {offsets = [20, 0], sizes = [10, 16], strides = [1, 1]} : vector<30x16xf32> to vector<10x16xf32>
    %cst_6 = arith.constant 1.000000e-03 : f32
    %8 = vector.broadcast %cst_6 : f32 to vector<10x16xf32>
    %9 = arith.mulf %7, %8 : vector<10x16xf32>
    %10 = vector.extract_strided_slice %6 {offsets = [0, 0], sizes = [15, 16], strides = [1, 1]} : vector<20x16xf32> to vector<15x16xf32>
    %11 = vector.extract_strided_slice %6 {offsets = [1, 0], sizes = [15, 16], strides = [1, 1]} : vector<20x16xf32> to vector<15x16xf32>
    %12 = vector.extract_strided_slice %6 {offsets = [2, 0], sizes = [15, 16], strides = [1, 1]} : vector<20x16xf32> to vector<15x16xf32>
    %13 = vector.extract_strided_slice %6 {offsets = [3, 0], sizes = [15, 16], strides = [1, 1]} : vector<20x16xf32> to vector<15x16xf32>
    %14 = vector.extract_strided_slice %6 {offsets = [4, 0], sizes = [15, 16], strides = [1, 1]} : vector<20x16xf32> to vector<15x16xf32>
    %15 = vector.extract_strided_slice %6 {offsets = [5, 0], sizes = [15, 16], strides = [1, 1]} : vector<20x16xf32> to vector<15x16xf32>
    %16 = tpu.concatenate %10, %11, %12, %13, %14, %15 in 1 : vector<15x16xf32>, vector<15x16xf32>, vector<15x16xf32>, vector<15x16xf32>, vector<15x16xf32>, vector<15x16xf32> -> vector<15x96xf32>
    %17 = arith.truncf %16 : vector<15x96xf32> to vector<15x96xbf16>
    %c0_7 = arith.constant 0 : index
    %c0_8 = arith.constant 0 : index
    %18 = vector.load %arg8[%c0_7, %c0_8] : memref<96x32xbf16, #tpu.memory_space<vmem>>, vector<96x32xbf16>
    %cst_9 = arith.constant dense<0.000000e+00> : vector<15x32xf32>
    %19 = tpu.matmul %17, %18, %cst_9 {dimension_numbers = #tpu.dot_dimension_numbers<[1], [0], [0], [1], [0, 0, 1, 1], [], []>} : vector<15x96xbf16>, vector<96x32xbf16>, vector<15x32xf32> -> vector<15x32xf32>
    %cst_10 = arith.constant 0.000000e+00 : f32
    %20 = vector.broadcast %cst_10 : f32 to vector<15x32xf32>
    %21 = arith.maximumf %19, %20 : vector<15x32xf32>
    %22 = vector.extract_strided_slice %21 {offsets = [0, 0], sizes = [11, 32], strides = [1, 1]} : vector<15x32xf32> to vector<11x32xf32>
    %23 = vector.extract_strided_slice %21 {offsets = [1, 0], sizes = [11, 32], strides = [1, 1]} : vector<15x32xf32> to vector<11x32xf32>
    %24 = vector.extract_strided_slice %21 {offsets = [2, 0], sizes = [11, 32], strides = [1, 1]} : vector<15x32xf32> to vector<11x32xf32>
    %25 = vector.extract_strided_slice %21 {offsets = [3, 0], sizes = [11, 32], strides = [1, 1]} : vector<15x32xf32> to vector<11x32xf32>
    %26 = vector.extract_strided_slice %21 {offsets = [4, 0], sizes = [11, 32], strides = [1, 1]} : vector<15x32xf32> to vector<11x32xf32>
    %27 = tpu.concatenate %22, %23, %24, %25, %26 in 1 : vector<11x32xf32>, vector<11x32xf32>, vector<11x32xf32>, vector<11x32xf32>, vector<11x32xf32> -> vector<11x160xf32>
    %28 = arith.truncf %27 : vector<11x160xf32> to vector<11x160xbf16>
    %c0_11 = arith.constant 0 : index
    %c0_12 = arith.constant 0 : index
    %29 = vector.load %arg9[%c0_11, %c0_12] : memref<160x32xbf16, #tpu.memory_space<vmem>>, vector<160x32xbf16>
    %cst_13 = arith.constant dense<0.000000e+00> : vector<11x32xf32>
    %30 = tpu.matmul %28, %29, %cst_13 {dimension_numbers = #tpu.dot_dimension_numbers<[1], [0], [0], [1], [0, 0, 1, 1], [], []>} : vector<11x160xbf16>, vector<160x32xbf16>, vector<11x32xf32> -> vector<11x32xf32>
    %cst_14 = arith.constant 0.000000e+00 : f32
    %31 = vector.broadcast %cst_14 : f32 to vector<11x32xf32>
    %32 = arith.maximumf %30, %31 : vector<11x32xf32>
    %33 = vector.extract_strided_slice %9 {offsets = [0, 0], sizes = [5, 16], strides = [1, 1]} : vector<10x16xf32> to vector<5x16xf32>
    %34 = vector.extract_strided_slice %9 {offsets = [1, 0], sizes = [5, 16], strides = [1, 1]} : vector<10x16xf32> to vector<5x16xf32>
    %35 = vector.extract_strided_slice %9 {offsets = [2, 0], sizes = [5, 16], strides = [1, 1]} : vector<10x16xf32> to vector<5x16xf32>
    %36 = vector.extract_strided_slice %9 {offsets = [3, 0], sizes = [5, 16], strides = [1, 1]} : vector<10x16xf32> to vector<5x16xf32>
    %37 = vector.extract_strided_slice %9 {offsets = [4, 0], sizes = [5, 16], strides = [1, 1]} : vector<10x16xf32> to vector<5x16xf32>
    %38 = vector.extract_strided_slice %9 {offsets = [5, 0], sizes = [5, 16], strides = [1, 1]} : vector<10x16xf32> to vector<5x16xf32>
    %39 = tpu.concatenate %33, %34, %35, %36, %37, %38 in 1 : vector<5x16xf32>, vector<5x16xf32>, vector<5x16xf32>, vector<5x16xf32>, vector<5x16xf32>, vector<5x16xf32> -> vector<5x96xf32>
    %40 = arith.truncf %39 : vector<5x96xf32> to vector<5x96xbf16>
    %c0_15 = arith.constant 0 : index
    %c0_16 = arith.constant 0 : index
    %41 = vector.load %arg6[%c0_15, %c0_16] : memref<96x32xbf16, #tpu.memory_space<vmem>>, vector<96x32xbf16>
    %cst_17 = arith.constant dense<0.000000e+00> : vector<5x32xf32>
    %42 = tpu.matmul %40, %41, %cst_17 {dimension_numbers = #tpu.dot_dimension_numbers<[1], [0], [0], [1], [0, 0, 1, 1], [], []>} : vector<5x96xbf16>, vector<96x32xbf16>, vector<5x32xf32> -> vector<5x32xf32>
    %cst_18 = arith.constant 0.000000e+00 : f32
    %43 = vector.broadcast %cst_18 : f32 to vector<5x32xf32>
    %44 = arith.maximumf %42, %43 : vector<5x32xf32>
    %45 = vector.extract_strided_slice %44 {offsets = [0, 0], sizes = [1, 32], strides = [1, 1]} : vector<5x32xf32> to vector<1x32xf32>
    %46 = vector.extract_strided_slice %44 {offsets = [1, 0], sizes = [1, 32], strides = [1, 1]} : vector<5x32xf32> to vector<1x32xf32>
    %47 = vector.extract_strided_slice %44 {offsets = [2, 0], sizes = [1, 32], strides = [1, 1]} : vector<5x32xf32> to vector<1x32xf32>
    %48 = vector.extract_strided_slice %44 {offsets = [3, 0], sizes = [1, 32], strides = [1, 1]} : vector<5x32xf32> to vector<1x32xf32>
    %49 = vector.extract_strided_slice %44 {offsets = [4, 0], sizes = [1, 32], strides = [1, 1]} : vector<5x32xf32> to vector<1x32xf32>
    %50 = tpu.concatenate %45, %46, %47, %48, %49 in 1 : vector<1x32xf32>, vector<1x32xf32>, vector<1x32xf32>, vector<1x32xf32>, vector<1x32xf32> -> vector<1x160xf32>
    %51 = arith.truncf %50 : vector<1x160xf32> to vector<1x160xbf16>
    %c0_19 = arith.constant 0 : index
    %c0_20 = arith.constant 0 : index
    %52 = vector.load %arg7[%c0_19, %c0_20] : memref<160x32xbf16, #tpu.memory_space<vmem>>, vector<160x32xbf16>
    %cst_21 = arith.constant dense<0.000000e+00> : vector<1x32xf32>
    %53 = tpu.matmul %51, %52, %cst_21 {dimension_numbers = #tpu.dot_dimension_numbers<[1], [0], [0], [1], [0, 0, 1, 1], [], []>} : vector<1x160xbf16>, vector<160x32xbf16>, vector<1x32xf32> -> vector<1x32xf32>
    %cst_22 = arith.constant 0.000000e+00 : f32
    %54 = vector.broadcast %cst_22 : f32 to vector<1x32xf32>
    %55 = arith.maximumf %53, %54 : vector<1x32xf32>
    %cst_23 = arith.constant dense<0.000000e+00> : vector<1x11xf32>
    %56 = tpu.matmul %55, %32, %cst_23 {dimension_numbers = #tpu.dot_dimension_numbers<[1], [1], [0], [0], [0, 0, 1, 0], [], []>} : vector<1x32xf32>, vector<11x32xf32>, vector<1x11xf32> -> vector<1x11xf32>
    %cst_24 = arith.constant 1.000000e-15 : f32
    %57 = vector.broadcast %cst_24 : f32 to vector<1x11xf32>
    %58 = arith.addf %56, %57 : vector<1x11xf32>
    %cst_25 = arith.constant dense<0.000000e+00> : vector<1xf32>
    %59 = vector.multi_reduction <add>, %58, %cst_25 [1] : vector<1x11xf32> to vector<1xf32>
    %60 = vector.shape_cast %59 : vector<1xf32> to vector<1x1xf32>
    %61 = vector.broadcast %60 : vector<1x1xf32> to vector<1x11xf32>
    %62 = arith.divf %58, %61 : vector<1x11xf32>
    %63 = vector.extract_strided_slice %1 {offsets = [0, 0], sizes = [20, 16], strides = [1, 1]} : vector<30x16xf32> to vector<20x16xf32>
    %64 = vector.extract_strided_slice %1 {offsets = [1, 0], sizes = [20, 16], strides = [1, 1]} : vector<30x16xf32> to vector<20x16xf32>
    %65 = vector.extract_strided_slice %1 {offsets = [2, 0], sizes = [20, 16], strides = [1, 1]} : vector<30x16xf32> to vector<20x16xf32>
    %66 = vector.extract_strided_slice %1 {offsets = [3, 0], sizes = [20, 16], strides = [1, 1]} : vector<30x16xf32> to vector<20x16xf32>
    %67 = vector.extract_strided_slice %1 {offsets = [4, 0], sizes = [20, 16], strides = [1, 1]} : vector<30x16xf32> to vector<20x16xf32>
    %68 = vector.extract_strided_slice %1 {offsets = [5, 0], sizes = [20, 16], strides = [1, 1]} : vector<30x16xf32> to vector<20x16xf32>
    %69 = vector.extract_strided_slice %1 {offsets = [6, 0], sizes = [20, 16], strides = [1, 1]} : vector<30x16xf32> to vector<20x16xf32>
    %70 = vector.extract_strided_slice %1 {offsets = [7, 0], sizes = [20, 16], strides = [1, 1]} : vector<30x16xf32> to vector<20x16xf32>
    %71 = vector.extract_strided_slice %1 {offsets = [8, 0], sizes = [20, 16], strides = [1, 1]} : vector<30x16xf32> to vector<20x16xf32>
    %72 = vector.extract_strided_slice %1 {offsets = [9, 0], sizes = [20, 16], strides = [1, 1]} : vector<30x16xf32> to vector<20x16xf32>
    %73 = vector.extract_strided_slice %1 {offsets = [10, 0], sizes = [20, 16], strides = [1, 1]} : vector<30x16xf32> to vector<20x16xf32>
    %74 = tpu.concatenate %63, %64, %65, %66, %67, %68, %69, %70, %71, %72, %73 in 0 : vector<20x16xf32>, vector<20x16xf32>, vector<20x16xf32>, vector<20x16xf32>, vector<20x16xf32>, vector<20x16xf32>, vector<20x16xf32>, vector<20x16xf32>, vector<20x16xf32>, vector<20x16xf32>, vector<20x16xf32> -> vector<220x16xf32>
    %c0_26 = arith.constant 0 : index
    %c0_27 = arith.constant 0 : index
    %75 = vector.load %arg4[%c0_26, %c0_27] : memref<11x220xf32, #tpu.memory_space<vmem>>, vector<11x220xf32>
    %cst_28 = arith.constant dense<0.000000e+00> : vector<1x220xf32>
    %76 = tpu.matmul %62, %75, %cst_28 {dimension_numbers = #tpu.dot_dimension_numbers<[1], [0], [0], [1], [0, 0, 1, 1], [], []>} : vector<1x11xf32>, vector<11x220xf32>, vector<1x220xf32> -> vector<1x220xf32>
    %c0_29 = arith.constant 0 : index
    %c0_30 = arith.constant 0 : index
    %77 = vector.load %arg5[%c0_29, %c0_30] : memref<20x220xf32, #tpu.memory_space<vmem>>, vector<20x220xf32>
    %78 = vector.broadcast %76 : vector<1x220xf32> to vector<20x220xf32>
    %79 = arith.mulf %77, %78 : vector<20x220xf32>
    %cst_31 = arith.constant dense<0.000000e+00> : vector<20x16xf32>
    %80 = tpu.matmul %79, %74, %cst_31 {dimension_numbers = #tpu.dot_dimension_numbers<[1], [0], [0], [1], [0, 0, 1, 1], [], []>} : vector<20x220xf32>, vector<220x16xf32>, vector<20x16xf32> -> vector<20x16xf32>
    %cst_32 = arith.constant dense<0.000000e+00> : vector<16x10xf32>
    %81 = tpu.matmul %80, %2, %cst_32 {dimension_numbers = #tpu.dot_dimension_numbers<[0], [1], [1], [0], [0, 1, 1, 0], [], []>} : vector<20x16xf32>, vector<10x20xf32>, vector<16x10xf32> -> vector<16x10xf32>
    %82 = vector.extract_strided_slice %1 {offsets = [20, 0], sizes = [10, 16], strides = [1, 1]} : vector<30x16xf32> to vector<10x16xf32>
    %83 = vector.extract_strided_slice %1 {offsets = [29, 0], sizes = [1, 16], strides = [1, 1]} : vector<30x16xf32> to vector<1x16xf32>
    %84 = vector.shape_cast %83 : vector<1x16xf32> to vector<1x16xf32>
    %85 = vector.broadcast %84 : vector<1x16xf32> to vector<10x16xf32>
    %86 = tpu.concatenate %82, %85 in 0 : vector<10x16xf32>, vector<10x16xf32> -> vector<20x16xf32>
    %cst_33 = arith.constant dense<0.000000e+00> : vector<16x10xf32>
    %87 = tpu.matmul %86, %2, %cst_33 {dimension_numbers = #tpu.dot_dimension_numbers<[0], [1], [1], [0], [0, 1, 1, 0], [], []>} : vector<20x16xf32>, vector<10x20xf32>, vector<16x10xf32> -> vector<16x10xf32>
    %88 = arith.truncf %81 : vector<16x10xf32> to vector<16x10xbf16>
    %c0_34 = arith.constant 0 : index
    %c0_35 = arith.constant 0 : index
    %c0_36 = arith.constant 0 : index
    %89 = vector.load %arg10[%c0_34, %c0_35, %c0_36] : memref<3x16x16xbf16, #tpu.memory_space<vmem>>, vector<1x16x16xbf16>
    %90 = vector.shape_cast %89 : vector<1x16x16xbf16> to vector<16x16xbf16>
    %91 = arith.truncf %87 : vector<16x10xf32> to vector<16x10xbf16>
    %cst_37 = arith.constant dense<0.000000e+00> : vector<16x10xf32>
    %92 = tpu.matmul %90, %91, %cst_37 {dimension_numbers = #tpu.dot_dimension_numbers<[1], [0], [0], [1], [0, 0, 1, 1], [], []>} : vector<16x16xbf16>, vector<16x10xbf16>, vector<16x10xf32> -> vector<16x10xf32>
    %93 = arith.truncf %92 : vector<16x10xf32> to vector<16x10xbf16>
    %c0_38 = arith.constant 0 : index
    %c0_39 = arith.constant 0 : index
    %c0_40 = arith.constant 0 : index
    %94 = vector.load %arg11[%c0_38, %c0_39, %c0_40] : memref<3x10x32xbf16, #tpu.memory_space<vmem>>, vector<1x10x32xbf16>
    %95 = vector.shape_cast %94 : vector<1x10x32xbf16> to vector<10x32xbf16>
    %cst_41 = arith.constant dense<0.000000e+00> : vector<16x32xf32>
    %96 = tpu.matmul %93, %95, %cst_41 {dimension_numbers = #tpu.dot_dimension_numbers<[1], [0], [0], [1], [0, 0, 1, 1], [], []>} : vector<16x10xbf16>, vector<10x32xbf16>, vector<16x32xf32> -> vector<16x32xf32>
    %cst_42 = arith.constant dense<0.000000e+00> : vector<16x10xf32>
    %97 = tpu.matmul %90, %88, %cst_42 {dimension_numbers = #tpu.dot_dimension_numbers<[1], [0], [0], [1], [0, 0, 1, 1], [], []>} : vector<16x16xbf16>, vector<16x10xbf16>, vector<16x10xf32> -> vector<16x10xf32>
    %98 = arith.truncf %97 : vector<16x10xf32> to vector<16x10xbf16>
    %c0_43 = arith.constant 0 : index
    %c0_44 = arith.constant 0 : index
    %c0_45 = arith.constant 0 : index
    %99 = vector.load %arg12[%c0_43, %c0_44, %c0_45] : memref<3x10x32xbf16, #tpu.memory_space<vmem>>, vector<1x10x32xbf16>
    %100 = vector.shape_cast %99 : vector<1x10x32xbf16> to vector<10x32xbf16>
    %cst_46 = arith.constant dense<0.000000e+00> : vector<16x32xf32>
    %101 = tpu.matmul %98, %100, %cst_46 {dimension_numbers = #tpu.dot_dimension_numbers<[1], [0], [0], [1], [0, 0, 1, 1], [], []>} : vector<16x10xbf16>, vector<10x32xbf16>, vector<16x32xf32> -> vector<16x32xf32>
    %102 = arith.addf %96, %101 : vector<16x32xf32>
    %103 = math.tanh %102 : vector<16x32xf32>
    %c0_47 = arith.constant 0 : index
    %c0_48 = arith.constant 0 : index
    %c0_49 = arith.constant 0 : index
    %c0_50 = arith.constant 0 : index
    %104 = vector.load %arg13[%c0_47, %c0_48, %c0_49, %c0_50] : memref<3x2x16x16xbf16, #tpu.memory_space<vmem>>, vector<1x1x16x16xbf16>
    %105 = vector.shape_cast %104 : vector<1x1x16x16xbf16> to vector<16x16xbf16>
    %106 = arith.truncf %103 : vector<16x32xf32> to vector<16x32xbf16>
    %cst_51 = arith.constant dense<0.000000e+00> : vector<16x32xf32>
    %107 = tpu.matmul %105, %106, %cst_51 {dimension_numbers = #tpu.dot_dimension_numbers<[1], [0], [0], [1], [0, 0, 1, 1], [], []>} : vector<16x16xbf16>, vector<16x32xbf16>, vector<16x32xf32> -> vector<16x32xf32>
    %cst_52 = arith.constant 0.899999976 : f32
    %108 = vector.broadcast %cst_52 : f32 to vector<16x32xf32>
    %109 = arith.mulf %108, %107 : vector<16x32xf32>
    %cst_53 = arith.constant 1.000000e-01 : f32
    %110 = vector.broadcast %cst_53 : f32 to vector<16x32xf32>
    %111 = arith.mulf %110, %103 : vector<16x32xf32>
    %112 = arith.addf %109, %111 : vector<16x32xf32>
    %cst_54 = arith.constant 0.594534874 : f32
    %113 = vector.broadcast %cst_54 : f32 to vector<16x32xf32>
    %114 = arith.mulf %113, %112 : vector<16x32xf32>
    %115 = arith.truncf %112 : vector<16x32xf32> to vector<16x32xbf16>
    %c0_55 = arith.constant 0 : index
    %c0_56 = arith.constant 0 : index
    %c0_57 = arith.constant 0 : index
    %c0_58 = arith.constant 0 : index
    %116 = vector.load %arg14[%c0_55, %c0_56, %c0_57, %c0_58] : memref<3x2x32x32xbf16, #tpu.memory_space<vmem>>, vector<1x1x32x32xbf16>
    %117 = vector.shape_cast %116 : vector<1x1x32x32xbf16> to vector<32x32xbf16>
    %cst_59 = arith.constant dense<0.000000e+00> : vector<16x32xf32>
    %118 = tpu.matmul %115, %117, %cst_59 {dimension_numbers = #tpu.dot_dimension_numbers<[1], [0], [0], [1], [0, 0, 1, 1], [], []>} : vector<16x32xbf16>, vector<32x32xbf16>, vector<16x32xf32> -> vector<16x32xf32>
    %cst_60 = arith.constant 0.405465096 : f32
    %119 = vector.broadcast %cst_60 : f32 to vector<16x32xf32>
    %120 = arith.mulf %119, %118 : vector<16x32xf32>
    %121 = arith.addf %114, %120 : vector<16x32xf32>
    %122 = math.tanh %121 : vector<16x32xf32>
    %c0_61 = arith.constant 0 : index
    %c1 = arith.constant 1 : index
    %c0_62 = arith.constant 0 : index
    %c0_63 = arith.constant 0 : index
    %123 = vector.load %arg13[%c0_61, %c1, %c0_62, %c0_63] : memref<3x2x16x16xbf16, #tpu.memory_space<vmem>>, vector<1x1x16x16xbf16>
    %124 = vector.shape_cast %123 : vector<1x1x16x16xbf16> to vector<16x16xbf16>
    %125 = arith.truncf %122 : vector<16x32xf32> to vector<16x32xbf16>
    %cst_64 = arith.constant dense<0.000000e+00> : vector<16x32xf32>
    %126 = tpu.matmul %124, %125, %cst_64 {dimension_numbers = #tpu.dot_dimension_numbers<[1], [0], [0], [1], [0, 0, 1, 1], [], []>} : vector<16x16xbf16>, vector<16x32xbf16>, vector<16x32xf32> -> vector<16x32xf32>
    %cst_65 = arith.constant 0.899999976 : f32
    %127 = vector.broadcast %cst_65 : f32 to vector<16x32xf32>
    %128 = arith.mulf %127, %126 : vector<16x32xf32>
    %cst_66 = arith.constant 1.000000e-01 : f32
    %129 = vector.broadcast %cst_66 : f32 to vector<16x32xf32>
    %130 = arith.mulf %129, %103 : vector<16x32xf32>
    %131 = arith.addf %128, %130 : vector<16x32xf32>
    %cst_67 = arith.constant 0.776856422 : f32
    %132 = vector.broadcast %cst_67 : f32 to vector<16x32xf32>
    %133 = arith.mulf %132, %131 : vector<16x32xf32>
    %134 = arith.truncf %131 : vector<16x32xf32> to vector<16x32xbf16>
    %c0_68 = arith.constant 0 : index
    %c1_69 = arith.constant 1 : index
    %c0_70 = arith.constant 0 : index
    %c0_71 = arith.constant 0 : index
    %135 = vector.load %arg14[%c0_68, %c1_69, %c0_70, %c0_71] : memref<3x2x32x32xbf16, #tpu.memory_space<vmem>>, vector<1x1x32x32xbf16>
    %136 = vector.shape_cast %135 : vector<1x1x32x32xbf16> to vector<32x32xbf16>
    %cst_72 = arith.constant dense<0.000000e+00> : vector<16x32xf32>
    %137 = tpu.matmul %134, %136, %cst_72 {dimension_numbers = #tpu.dot_dimension_numbers<[1], [0], [0], [1], [0, 0, 1, 1], [], []>} : vector<16x32xbf16>, vector<32x32xbf16>, vector<16x32xf32> -> vector<16x32xf32>
    %cst_73 = arith.constant 0.223143548 : f32
    %138 = vector.broadcast %cst_73 : f32 to vector<16x32xf32>
    %139 = arith.mulf %138, %137 : vector<16x32xf32>
    %140 = arith.addf %133, %139 : vector<16x32xf32>
    %141 = math.tanh %140 : vector<16x32xf32>
    %c0_74 = arith.constant 0 : index
    %c0_75 = arith.constant 0 : index
    %c0_76 = arith.constant 0 : index
    %142 = vector.load %arg15[%c0_74, %c0_75, %c0_76] : memref<3x16x16xbf16, #tpu.memory_space<vmem>>, vector<1x16x16xbf16>
    %143 = vector.shape_cast %142 : vector<1x16x16xbf16> to vector<16x16xbf16>
    %144 = arith.truncf %141 : vector<16x32xf32> to vector<16x32xbf16>
    %cst_77 = arith.constant dense<0.000000e+00> : vector<16x32xf32>
    %145 = tpu.matmul %143, %144, %cst_77 {dimension_numbers = #tpu.dot_dimension_numbers<[1], [0], [0], [1], [0, 0, 1, 1], [], []>} : vector<16x16xbf16>, vector<16x32xbf16>, vector<16x32xf32> -> vector<16x32xf32>
    %146 = arith.truncf %145 : vector<16x32xf32> to vector<16x32xbf16>
    %c0_78 = arith.constant 0 : index
    %c0_79 = arith.constant 0 : index
    %c0_80 = arith.constant 0 : index
    %147 = vector.load %arg16[%c0_78, %c0_79, %c0_80] : memref<3x32x10xbf16, #tpu.memory_space<vmem>>, vector<1x32x10xbf16>
    %148 = vector.shape_cast %147 : vector<1x32x10xbf16> to vector<32x10xbf16>
    %cst_81 = arith.constant dense<0.000000e+00> : vector<16x10xf32>
    %149 = tpu.matmul %146, %148, %cst_81 {dimension_numbers = #tpu.dot_dimension_numbers<[1], [0], [0], [1], [0, 0, 1, 1], [], []>} : vector<16x32xbf16>, vector<32x10xbf16>, vector<16x10xf32> -> vector<16x10xf32>
    %150 = arith.addf %149, %87 : vector<16x10xf32>
    %cst_82 = arith.constant dense<0.000000e+00> : vector<16x20xf32>
    %151 = tpu.matmul %150, %3, %cst_82 {dimension_numbers = #tpu.dot_dimension_numbers<[1], [1], [0], [0], [0, 0, 1, 0], [], []>} : vector<16x10xf32>, vector<20x10xf32>, vector<16x20xf32> -> vector<16x20xf32>
    %c1_83 = arith.constant 1 : index
    %c0_84 = arith.constant 0 : index
    %c0_85 = arith.constant 0 : index
    %152 = vector.load %arg10[%c1_83, %c0_84, %c0_85] : memref<3x16x16xbf16, #tpu.memory_space<vmem>>, vector<1x16x16xbf16>
    %153 = vector.shape_cast %152 : vector<1x16x16xbf16> to vector<16x16xbf16>
    %154 = arith.truncf %150 : vector<16x10xf32> to vector<16x10xbf16>
    %cst_86 = arith.constant dense<0.000000e+00> : vector<16x10xf32>
    %155 = tpu.matmul %153, %154, %cst_86 {dimension_numbers = #tpu.dot_dimension_numbers<[1], [0], [0], [1], [0, 0, 1, 1], [], []>} : vector<16x16xbf16>, vector<16x10xbf16>, vector<16x10xf32> -> vector<16x10xf32>
    %156 = arith.truncf %155 : vector<16x10xf32> to vector<16x10xbf16>
    %c1_87 = arith.constant 1 : index
    %c0_88 = arith.constant 0 : index
    %c0_89 = arith.constant 0 : index
    %157 = vector.load %arg11[%c1_87, %c0_88, %c0_89] : memref<3x10x32xbf16, #tpu.memory_space<vmem>>, vector<1x10x32xbf16>
    %158 = vector.shape_cast %157 : vector<1x10x32xbf16> to vector<10x32xbf16>
    %cst_90 = arith.constant dense<0.000000e+00> : vector<16x32xf32>
    %159 = tpu.matmul %156, %158, %cst_90 {dimension_numbers = #tpu.dot_dimension_numbers<[1], [0], [0], [1], [0, 0, 1, 1], [], []>} : vector<16x10xbf16>, vector<10x32xbf16>, vector<16x32xf32> -> vector<16x32xf32>
    %cst_91 = arith.constant dense<0.000000e+00> : vector<16x10xf32>
    %160 = tpu.matmul %153, %88, %cst_91 {dimension_numbers = #tpu.dot_dimension_numbers<[1], [0], [0], [1], [0, 0, 1, 1], [], []>} : vector<16x16xbf16>, vector<16x10xbf16>, vector<16x10xf32> -> vector<16x10xf32>
    %161 = arith.truncf %160 : vector<16x10xf32> to vector<16x10xbf16>
    %c1_92 = arith.constant 1 : index
    %c0_93 = arith.constant 0 : index
    %c0_94 = arith.constant 0 : index
    %162 = vector.load %arg12[%c1_92, %c0_93, %c0_94] : memref<3x10x32xbf16, #tpu.memory_space<vmem>>, vector<1x10x32xbf16>
    %163 = vector.shape_cast %162 : vector<1x10x32xbf16> to vector<10x32xbf16>
    %cst_95 = arith.constant dense<0.000000e+00> : vector<16x32xf32>
    %164 = tpu.matmul %161, %163, %cst_95 {dimension_numbers = #tpu.dot_dimension_numbers<[1], [0], [0], [1], [0, 0, 1, 1], [], []>} : vector<16x10xbf16>, vector<10x32xbf16>, vector<16x32xf32> -> vector<16x32xf32>
    %165 = arith.addf %159, %164 : vector<16x32xf32>
    %166 = math.tanh %165 : vector<16x32xf32>
    %167 = arith.addf %166, %103 : vector<16x32xf32>
    %c1_96 = arith.constant 1 : index
    %c0_97 = arith.constant 0 : index
    %c0_98 = arith.constant 0 : index
    %c0_99 = arith.constant 0 : index
    %168 = vector.load %arg13[%c1_96, %c0_97, %c0_98, %c0_99] : memref<3x2x16x16xbf16, #tpu.memory_space<vmem>>, vector<1x1x16x16xbf16>
    %169 = vector.shape_cast %168 : vector<1x1x16x16xbf16> to vector<16x16xbf16>
    %170 = arith.truncf %167 : vector<16x32xf32> to vector<16x32xbf16>
    %cst_100 = arith.constant dense<0.000000e+00> : vector<16x32xf32>
    %171 = tpu.matmul %169, %170, %cst_100 {dimension_numbers = #tpu.dot_dimension_numbers<[1], [0], [0], [1], [0, 0, 1, 1], [], []>} : vector<16x16xbf16>, vector<16x32xbf16>, vector<16x32xf32> -> vector<16x32xf32>
    %cst_101 = arith.constant 0.899999976 : f32
    %172 = vector.broadcast %cst_101 : f32 to vector<16x32xf32>
    %173 = arith.mulf %172, %171 : vector<16x32xf32>
    %cst_102 = arith.constant 1.000000e-01 : f32
    %174 = vector.broadcast %cst_102 : f32 to vector<16x32xf32>
    %175 = arith.mulf %174, %167 : vector<16x32xf32>
    %176 = arith.addf %173, %175 : vector<16x32xf32>
    %cst_103 = arith.constant 0.594534874 : f32
    %177 = vector.broadcast %cst_103 : f32 to vector<16x32xf32>
    %178 = arith.mulf %177, %176 : vector<16x32xf32>
    %179 = arith.truncf %176 : vector<16x32xf32> to vector<16x32xbf16>
    %c1_104 = arith.constant 1 : index
    %c0_105 = arith.constant 0 : index
    %c0_106 = arith.constant 0 : index
    %c0_107 = arith.constant 0 : index
    %180 = vector.load %arg14[%c1_104, %c0_105, %c0_106, %c0_107] : memref<3x2x32x32xbf16, #tpu.memory_space<vmem>>, vector<1x1x32x32xbf16>
    %181 = vector.shape_cast %180 : vector<1x1x32x32xbf16> to vector<32x32xbf16>
    %cst_108 = arith.constant dense<0.000000e+00> : vector<16x32xf32>
    %182 = tpu.matmul %179, %181, %cst_108 {dimension_numbers = #tpu.dot_dimension_numbers<[1], [0], [0], [1], [0, 0, 1, 1], [], []>} : vector<16x32xbf16>, vector<32x32xbf16>, vector<16x32xf32> -> vector<16x32xf32>
    %cst_109 = arith.constant 0.405465096 : f32
    %183 = vector.broadcast %cst_109 : f32 to vector<16x32xf32>
    %184 = arith.mulf %183, %182 : vector<16x32xf32>
    %185 = arith.addf %178, %184 : vector<16x32xf32>
    %186 = math.tanh %185 : vector<16x32xf32>
    %c1_110 = arith.constant 1 : index
    %c1_111 = arith.constant 1 : index
    %c0_112 = arith.constant 0 : index
    %c0_113 = arith.constant 0 : index
    %187 = vector.load %arg13[%c1_110, %c1_111, %c0_112, %c0_113] : memref<3x2x16x16xbf16, #tpu.memory_space<vmem>>, vector<1x1x16x16xbf16>
    %188 = vector.shape_cast %187 : vector<1x1x16x16xbf16> to vector<16x16xbf16>
    %189 = arith.truncf %186 : vector<16x32xf32> to vector<16x32xbf16>
    %cst_114 = arith.constant dense<0.000000e+00> : vector<16x32xf32>
    %190 = tpu.matmul %188, %189, %cst_114 {dimension_numbers = #tpu.dot_dimension_numbers<[1], [0], [0], [1], [0, 0, 1, 1], [], []>} : vector<16x16xbf16>, vector<16x32xbf16>, vector<16x32xf32> -> vector<16x32xf32>
    %cst_115 = arith.constant 0.899999976 : f32
    %191 = vector.broadcast %cst_115 : f32 to vector<16x32xf32>
    %192 = arith.mulf %191, %190 : vector<16x32xf32>
    %cst_116 = arith.constant 1.000000e-01 : f32
    %193 = vector.broadcast %cst_116 : f32 to vector<16x32xf32>
    %194 = arith.mulf %193, %167 : vector<16x32xf32>
    %195 = arith.addf %192, %194 : vector<16x32xf32>
    %cst_117 = arith.constant 0.776856422 : f32
    %196 = vector.broadcast %cst_117 : f32 to vector<16x32xf32>
    %197 = arith.mulf %196, %195 : vector<16x32xf32>
    %198 = arith.truncf %195 : vector<16x32xf32> to vector<16x32xbf16>
    %c1_118 = arith.constant 1 : index
    %c1_119 = arith.constant 1 : index
    %c0_120 = arith.constant 0 : index
    %c0_121 = arith.constant 0 : index
    %199 = vector.load %arg14[%c1_118, %c1_119, %c0_120, %c0_121] : memref<3x2x32x32xbf16, #tpu.memory_space<vmem>>, vector<1x1x32x32xbf16>
    %200 = vector.shape_cast %199 : vector<1x1x32x32xbf16> to vector<32x32xbf16>
    %cst_122 = arith.constant dense<0.000000e+00> : vector<16x32xf32>
    %201 = tpu.matmul %198, %200, %cst_122 {dimension_numbers = #tpu.dot_dimension_numbers<[1], [0], [0], [1], [0, 0, 1, 1], [], []>} : vector<16x32xbf16>, vector<32x32xbf16>, vector<16x32xf32> -> vector<16x32xf32>
    %cst_123 = arith.constant 0.223143548 : f32
    %202 = vector.broadcast %cst_123 : f32 to vector<16x32xf32>
    %203 = arith.mulf %202, %201 : vector<16x32xf32>
    %204 = arith.addf %197, %203 : vector<16x32xf32>
    %205 = math.tanh %204 : vector<16x32xf32>
    %c1_124 = arith.constant 1 : index
    %c0_125 = arith.constant 0 : index
    %c0_126 = arith.constant 0 : index
    %206 = vector.load %arg15[%c1_124, %c0_125, %c0_126] : memref<3x16x16xbf16, #tpu.memory_space<vmem>>, vector<1x16x16xbf16>
    %207 = vector.shape_cast %206 : vector<1x16x16xbf16> to vector<16x16xbf16>
    %208 = arith.truncf %205 : vector<16x32xf32> to vector<16x32xbf16>
    %cst_127 = arith.constant dense<0.000000e+00> : vector<16x32xf32>
    %209 = tpu.matmul %207, %208, %cst_127 {dimension_numbers = #tpu.dot_dimension_numbers<[1], [0], [0], [1], [0, 0, 1, 1], [], []>} : vector<16x16xbf16>, vector<16x32xbf16>, vector<16x32xf32> -> vector<16x32xf32>
    %210 = arith.truncf %209 : vector<16x32xf32> to vector<16x32xbf16>
    %c1_128 = arith.constant 1 : index
    %c0_129 = arith.constant 0 : index
    %c0_130 = arith.constant 0 : index
    %211 = vector.load %arg16[%c1_128, %c0_129, %c0_130] : memref<3x32x10xbf16, #tpu.memory_space<vmem>>, vector<1x32x10xbf16>
    %212 = vector.shape_cast %211 : vector<1x32x10xbf16> to vector<32x10xbf16>
    %cst_131 = arith.constant dense<0.000000e+00> : vector<16x10xf32>
    %213 = tpu.matmul %210, %212, %cst_131 {dimension_numbers = #tpu.dot_dimension_numbers<[1], [0], [0], [1], [0, 0, 1, 1], [], []>} : vector<16x32xbf16>, vector<32x10xbf16>, vector<16x10xf32> -> vector<16x10xf32>
    %214 = arith.addf %213, %150 : vector<16x10xf32>
    %cst_132 = arith.constant dense<0.000000e+00> : vector<16x20xf32>
    %215 = tpu.matmul %214, %3, %cst_132 {dimension_numbers = #tpu.dot_dimension_numbers<[1], [1], [0], [0], [0, 0, 1, 0], [], []>} : vector<16x10xf32>, vector<20x10xf32>, vector<16x20xf32> -> vector<16x20xf32>
    %c2 = arith.constant 2 : index
    %c0_133 = arith.constant 0 : index
    %c0_134 = arith.constant 0 : index
    %216 = vector.load %arg10[%c2, %c0_133, %c0_134] : memref<3x16x16xbf16, #tpu.memory_space<vmem>>, vector<1x16x16xbf16>
    %217 = vector.shape_cast %216 : vector<1x16x16xbf16> to vector<16x16xbf16>
    %218 = arith.truncf %214 : vector<16x10xf32> to vector<16x10xbf16>
    %cst_135 = arith.constant dense<0.000000e+00> : vector<16x10xf32>
    %219 = tpu.matmul %217, %218, %cst_135 {dimension_numbers = #tpu.dot_dimension_numbers<[1], [0], [0], [1], [0, 0, 1, 1], [], []>} : vector<16x16xbf16>, vector<16x10xbf16>, vector<16x10xf32> -> vector<16x10xf32>
    %220 = arith.truncf %219 : vector<16x10xf32> to vector<16x10xbf16>
    %c2_136 = arith.constant 2 : index
    %c0_137 = arith.constant 0 : index
    %c0_138 = arith.constant 0 : index
    %221 = vector.load %arg11[%c2_136, %c0_137, %c0_138] : memref<3x10x32xbf16, #tpu.memory_space<vmem>>, vector<1x10x32xbf16>
    %222 = vector.shape_cast %221 : vector<1x10x32xbf16> to vector<10x32xbf16>
    %cst_139 = arith.constant dense<0.000000e+00> : vector<16x32xf32>
    %223 = tpu.matmul %220, %222, %cst_139 {dimension_numbers = #tpu.dot_dimension_numbers<[1], [0], [0], [1], [0, 0, 1, 1], [], []>} : vector<16x10xbf16>, vector<10x32xbf16>, vector<16x32xf32> -> vector<16x32xf32>
    %cst_140 = arith.constant dense<0.000000e+00> : vector<16x10xf32>
    %224 = tpu.matmul %217, %88, %cst_140 {dimension_numbers = #tpu.dot_dimension_numbers<[1], [0], [0], [1], [0, 0, 1, 1], [], []>} : vector<16x16xbf16>, vector<16x10xbf16>, vector<16x10xf32> -> vector<16x10xf32>
    %225 = arith.truncf %224 : vector<16x10xf32> to vector<16x10xbf16>
    %c2_141 = arith.constant 2 : index
    %c0_142 = arith.constant 0 : index
    %c0_143 = arith.constant 0 : index
    %226 = vector.load %arg12[%c2_141, %c0_142, %c0_143] : memref<3x10x32xbf16, #tpu.memory_space<vmem>>, vector<1x10x32xbf16>
    %227 = vector.shape_cast %226 : vector<1x10x32xbf16> to vector<10x32xbf16>
    %cst_144 = arith.constant dense<0.000000e+00> : vector<16x32xf32>
    %228 = tpu.matmul %225, %227, %cst_144 {dimension_numbers = #tpu.dot_dimension_numbers<[1], [0], [0], [1], [0, 0, 1, 1], [], []>} : vector<16x10xbf16>, vector<10x32xbf16>, vector<16x32xf32> -> vector<16x32xf32>
    %229 = arith.addf %223, %228 : vector<16x32xf32>
    %230 = math.tanh %229 : vector<16x32xf32>
    %231 = arith.addf %230, %167 : vector<16x32xf32>
    %c2_145 = arith.constant 2 : index
    %c0_146 = arith.constant 0 : index
    %c0_147 = arith.constant 0 : index
    %c0_148 = arith.constant 0 : index
    %232 = vector.load %arg13[%c2_145, %c0_146, %c0_147, %c0_148] : memref<3x2x16x16xbf16, #tpu.memory_space<vmem>>, vector<1x1x16x16xbf16>
    %233 = vector.shape_cast %232 : vector<1x1x16x16xbf16> to vector<16x16xbf16>
    %234 = arith.truncf %231 : vector<16x32xf32> to vector<16x32xbf16>
    %cst_149 = arith.constant dense<0.000000e+00> : vector<16x32xf32>
    %235 = tpu.matmul %233, %234, %cst_149 {dimension_numbers = #tpu.dot_dimension_numbers<[1], [0], [0], [1], [0, 0, 1, 1], [], []>} : vector<16x16xbf16>, vector<16x32xbf16>, vector<16x32xf32> -> vector<16x32xf32>
    %cst_150 = arith.constant 0.899999976 : f32
    %236 = vector.broadcast %cst_150 : f32 to vector<16x32xf32>
    %237 = arith.mulf %236, %235 : vector<16x32xf32>
    %cst_151 = arith.constant 1.000000e-01 : f32
    %238 = vector.broadcast %cst_151 : f32 to vector<16x32xf32>
    %239 = arith.mulf %238, %231 : vector<16x32xf32>
    %240 = arith.addf %237, %239 : vector<16x32xf32>
    %cst_152 = arith.constant 0.594534874 : f32
    %241 = vector.broadcast %cst_152 : f32 to vector<16x32xf32>
    %242 = arith.mulf %241, %240 : vector<16x32xf32>
    %243 = arith.truncf %240 : vector<16x32xf32> to vector<16x32xbf16>
    %c2_153 = arith.constant 2 : index
    %c0_154 = arith.constant 0 : index
    %c0_155 = arith.constant 0 : index
    %c0_156 = arith.constant 0 : index
    %244 = vector.load %arg14[%c2_153, %c0_154, %c0_155, %c0_156] : memref<3x2x32x32xbf16, #tpu.memory_space<vmem>>, vector<1x1x32x32xbf16>
    %245 = vector.shape_cast %244 : vector<1x1x32x32xbf16> to vector<32x32xbf16>
    %cst_157 = arith.constant dense<0.000000e+00> : vector<16x32xf32>
    %246 = tpu.matmul %243, %245, %cst_157 {dimension_numbers = #tpu.dot_dimension_numbers<[1], [0], [0], [1], [0, 0, 1, 1], [], []>} : vector<16x32xbf16>, vector<32x32xbf16>, vector<16x32xf32> -> vector<16x32xf32>
    %cst_158 = arith.constant 0.405465096 : f32
    %247 = vector.broadcast %cst_158 : f32 to vector<16x32xf32>
    %248 = arith.mulf %247, %246 : vector<16x32xf32>
    %249 = arith.addf %242, %248 : vector<16x32xf32>
    %250 = math.tanh %249 : vector<16x32xf32>
    %c2_159 = arith.constant 2 : index
    %c1_160 = arith.constant 1 : index
    %c0_161 = arith.constant 0 : index
    %c0_162 = arith.constant 0 : index
    %251 = vector.load %arg13[%c2_159, %c1_160, %c0_161, %c0_162] : memref<3x2x16x16xbf16, #tpu.memory_space<vmem>>, vector<1x1x16x16xbf16>
    %252 = vector.shape_cast %251 : vector<1x1x16x16xbf16> to vector<16x16xbf16>
    %253 = arith.truncf %250 : vector<16x32xf32> to vector<16x32xbf16>
    %cst_163 = arith.constant dense<0.000000e+00> : vector<16x32xf32>
    %254 = tpu.matmul %252, %253, %cst_163 {dimension_numbers = #tpu.dot_dimension_numbers<[1], [0], [0], [1], [0, 0, 1, 1], [], []>} : vector<16x16xbf16>, vector<16x32xbf16>, vector<16x32xf32> -> vector<16x32xf32>
    %cst_164 = arith.constant 0.899999976 : f32
    %255 = vector.broadcast %cst_164 : f32 to vector<16x32xf32>
    %256 = arith.mulf %255, %254 : vector<16x32xf32>
    %cst_165 = arith.constant 1.000000e-01 : f32
    %257 = vector.broadcast %cst_165 : f32 to vector<16x32xf32>
    %258 = arith.mulf %257, %231 : vector<16x32xf32>
    %259 = arith.addf %256, %258 : vector<16x32xf32>
    %cst_166 = arith.constant 0.776856422 : f32
    %260 = vector.broadcast %cst_166 : f32 to vector<16x32xf32>
    %261 = arith.mulf %260, %259 : vector<16x32xf32>
    %262 = arith.truncf %259 : vector<16x32xf32> to vector<16x32xbf16>
    %c2_167 = arith.constant 2 : index
    %c1_168 = arith.constant 1 : index
    %c0_169 = arith.constant 0 : index
    %c0_170 = arith.constant 0 : index
    %263 = vector.load %arg14[%c2_167, %c1_168, %c0_169, %c0_170] : memref<3x2x32x32xbf16, #tpu.memory_space<vmem>>, vector<1x1x32x32xbf16>
    %264 = vector.shape_cast %263 : vector<1x1x32x32xbf16> to vector<32x32xbf16>
    %cst_171 = arith.constant dense<0.000000e+00> : vector<16x32xf32>
    %265 = tpu.matmul %262, %264, %cst_171 {dimension_numbers = #tpu.dot_dimension_numbers<[1], [0], [0], [1], [0, 0, 1, 1], [], []>} : vector<16x32xbf16>, vector<32x32xbf16>, vector<16x32xf32> -> vector<16x32xf32>
    %cst_172 = arith.constant 0.223143548 : f32
    %266 = vector.broadcast %cst_172 : f32 to vector<16x32xf32>
    %267 = arith.mulf %266, %265 : vector<16x32xf32>
    %268 = arith.addf %261, %267 : vector<16x32xf32>
    %269 = math.tanh %268 : vector<16x32xf32>
    %c2_173 = arith.constant 2 : index
    %c0_174 = arith.constant 0 : index
    %c0_175 = arith.constant 0 : index
    %270 = vector.load %arg15[%c2_173, %c0_174, %c0_175] : memref<3x16x16xbf16, #tpu.memory_space<vmem>>, vector<1x16x16xbf16>
    %271 = vector.shape_cast %270 : vector<1x16x16xbf16> to vector<16x16xbf16>
    %272 = arith.truncf %269 : vector<16x32xf32> to vector<16x32xbf16>
    %cst_176 = arith.constant dense<0.000000e+00> : vector<16x32xf32>
    %273 = tpu.matmul %271, %272, %cst_176 {dimension_numbers = #tpu.dot_dimension_numbers<[1], [0], [0], [1], [0, 0, 1, 1], [], []>} : vector<16x16xbf16>, vector<16x32xbf16>, vector<16x32xf32> -> vector<16x32xf32>
    %274 = arith.truncf %273 : vector<16x32xf32> to vector<16x32xbf16>
    %c2_177 = arith.constant 2 : index
    %c0_178 = arith.constant 0 : index
    %c0_179 = arith.constant 0 : index
    %275 = vector.load %arg16[%c2_177, %c0_178, %c0_179] : memref<3x32x10xbf16, #tpu.memory_space<vmem>>, vector<1x32x10xbf16>
    %276 = vector.shape_cast %275 : vector<1x32x10xbf16> to vector<32x10xbf16>
    %cst_180 = arith.constant dense<0.000000e+00> : vector<16x10xf32>
    %277 = tpu.matmul %274, %276, %cst_180 {dimension_numbers = #tpu.dot_dimension_numbers<[1], [0], [0], [1], [0, 0, 1, 1], [], []>} : vector<16x32xbf16>, vector<32x10xbf16>, vector<16x10xf32> -> vector<16x10xf32>
    %278 = arith.addf %277, %214 : vector<16x10xf32>
    %cst_181 = arith.constant dense<0.000000e+00> : vector<16x20xf32>
    %279 = tpu.matmul %278, %3, %cst_181 {dimension_numbers = #tpu.dot_dimension_numbers<[1], [1], [0], [0], [0, 0, 1, 0], [], []>} : vector<16x10xf32>, vector<20x10xf32>, vector<16x20xf32> -> vector<16x20xf32>
    %280 = tpu.concatenate %151, %215, %279 in 1 : vector<16x20xf32>, vector<16x20xf32>, vector<16x20xf32> -> vector<16x60xf32>
    %c0_182 = arith.constant 0 : index
    %c0_183 = arith.constant 0 : index
    %c0_184 = arith.constant 0 : index
    %281 = vector.load %arg17[%c0_182, %c0_183, %c0_184] : memref<1x16x60xf32, #tpu.memory_space<vmem>>, vector<1x16x60xf32>
    %282 = vector.shape_cast %281 : vector<1x16x60xf32> to vector<16x60xf32>
    %283 = vector.shape_cast %280 : vector<16x60xf32> to vector<1x16x60xf32>
    tpu.vector_store %arg17[%c0_182, %c0_183, %c0_184], %283 {strides = array<i32>} : memref<1x16x60xf32, #tpu.memory_space<vmem>>, vector<1x16x60xf32>,
    return
  }
  func.func @transform_0(%arg0: i32) -> (i32, i32, i32) {
    %c0_i32 = arith.constant 0 : i32
    %c0_i32_0 = arith.constant 0 : i32
    %c0_i32_1 = arith.constant 0 : i32
    return %arg0, %c0_i32, %c0_i32_0 : i32, i32, i32
  }
  func.func @transform_1(%arg0: i32) -> (i32, i32) {
    %c0_i32 = arith.constant 0 : i32
    %c0_i32_0 = arith.constant 0 : i32
    %c0_i32_1 = arith.constant 0 : i32
    return %c0_i32, %c0_i32_0 : i32, i32
  }
  func.func @transform_2(%arg0: i32) -> (i32, i32) {
    %c0_i32 = arith.constant 0 : i32
    %c0_i32_0 = arith.constant 0 : i32
    %c0_i32_1 = arith.constant 0 : i32
    return %c0_i32, %c0_i32_0 : i32, i32
  }
  func.func @transform_3(%arg0: i32) -> (i32, i32) {
    %c0_i32 = arith.constant 0 : i32
    %c0_i32_0 = arith.constant 0 : i32
    %c0_i32_1 = arith.constant 0 : i32
    return %c0_i32, %c0_i32_0 : i32, i32
  }
  func.func @transform_4(%arg0: i32) -> (i32, i32) {
    %c0_i32 = arith.constant 0 : i32
    %c0_i32_0 = arith.constant 0 : i32
    %c0_i32_1 = arith.constant 0 : i32
    return %c0_i32, %c0_i32_0 : i32, i32
  }
  func.func @transform_5(%arg0: i32) -> (i32, i32) {
    %c0_i32 = arith.constant 0 : i32
    %c0_i32_0 = arith.constant 0 : i32
    %c0_i32_1 = arith.constant 0 : i32
    return %c0_i32, %c0_i32_0 : i32, i32
  }
  func.func @transform_6(%arg0: i32) -> (i32, i32) {
    %c0_i32 = arith.constant 0 : i32
    %c0_i32_0 = arith.constant 0 : i32
    %c0_i32_1 = arith.constant 0 : i32
    return %c0_i32, %c0_i32_0 : i32, i32
  }
  func.func @transform_7(%arg0: i32) -> (i32, i32) {
    %c0_i32 = arith.constant 0 : i32
    %c0_i32_0 = arith.constant 0 : i32
    %c0_i32_1 = arith.constant 0 : i32
    return %c0_i32, %c0_i32_0 : i32, i32
  }
  func.func @transform_8(%arg0: i32) -> (i32, i32) {
    %c0_i32 = arith.constant 0 : i32
    %c0_i32_0 = arith.constant 0 : i32
    %c0_i32_1 = arith.constant 0 : i32
    return %c0_i32, %c0_i32_0 : i32, i32
  }
  func.func @transform_9(%arg0: i32) -> (i32, i32, i32) {
    %c0_i32 = arith.constant 0 : i32
    %c0_i32_0 = arith.constant 0 : i32
    %c0_i32_1 = arith.constant 0 : i32
    %c0_i32_2 = arith.constant 0 : i32
    return %c0_i32, %c0_i32_0, %c0_i32_1 : i32, i32, i32
  }
  func.func @transform_10(%arg0: i32) -> (i32, i32, i32) {
    %c0_i32 = arith.constant 0 : i32
    %c0_i32_0 = arith.constant 0 : i32
    %c0_i32_1 = arith.constant 0 : i32
    %c0_i32_2 = arith.constant 0 : i32
    return %c0_i32, %c0_i32_0, %c0_i32_1 : i32, i32, i32
  }
  func.func @transform_11(%arg0: i32) -> (i32, i32, i32) {
    %c0_i32 = arith.constant 0 : i32
    %c0_i32_0 = arith.constant 0 : i32
    %c0_i32_1 = arith.constant 0 : i32
    %c0_i32_2 = arith.constant 0 : i32
    return %c0_i32, %c0_i32_0, %c0_i32_1 : i32, i32, i32
  }
  func.func @transform_12(%arg0: i32) -> (i32, i32, i32, i32) {
    %c0_i32 = arith.constant 0 : i32
    %c0_i32_0 = arith.constant 0 : i32
    %c0_i32_1 = arith.constant 0 : i32
    %c0_i32_2 = arith.constant 0 : i32
    %c0_i32_3 = arith.constant 0 : i32
    return %c0_i32, %c0_i32_0, %c0_i32_1, %c0_i32_2 : i32, i32, i32, i32
  }
  func.func @transform_13(%arg0: i32) -> (i32, i32, i32, i32) {
    %c0_i32 = arith.constant 0 : i32
    %c0_i32_0 = arith.constant 0 : i32
    %c0_i32_1 = arith.constant 0 : i32
    %c0_i32_2 = arith.constant 0 : i32
    %c0_i32_3 = arith.constant 0 : i32
    return %c0_i32, %c0_i32_0, %c0_i32_1, %c0_i32_2 : i32, i32, i32, i32
  }
  func.func @transform_14(%arg0: i32) -> (i32, i32, i32) {
    %c0_i32 = arith.constant 0 : i32
    %c0_i32_0 = arith.constant 0 : i32
    %c0_i32_1 = arith.constant 0 : i32
    %c0_i32_2 = arith.constant 0 : i32
    return %c0_i32, %c0_i32_0, %c0_i32_1 : i32, i32, i32
  }
  func.func @transform_15(%arg0: i32) -> (i32, i32, i32) {
    %c0_i32 = arith.constant 0 : i32
    %c0_i32_0 = arith.constant 0 : i32
    %c0_i32_1 = arith.constant 0 : i32
    %c0_i32_2 = arith.constant 0 : i32
    return %c0_i32, %c0_i32_0, %c0_i32_1 : i32, i32, i32
  }
  func.func @transform_16(%arg0: i32) -> (i32, i32, i32) {
    %c0_i32 = arith.constant 0 : i32
    %c0_i32_0 = arith.constant 0 : i32
    %c0_i32_1 = arith.constant 0 : i32
    return %arg0, %c0_i32, %c0_i32_0 : i32, i32, i32
  }
}

</mosaic_0001>

<bundles_post_ra>
// kernel: att_model_forward.1
= control target key start
LH: loop header
LB: loop body
LE: loop exit
PB: predicated region body
PF: predicated region fallthrough
CT: control target
= control target key end

     0   :  { %s3260_s21 = smov 0   ;;  %s3886_s0 = inlined_call_operand.vmem [shape: f32[2,30,16], index: 0, kind: input, shape index: {}]   ;;  %s3887_s1 = inlined_call_operand.vmem [shape: f32[10,20], index: 1, kind: input, shape index: {}]   ;;  %s3888_s2 = inlined_call_operand.vmem [shape: f32[20,10], index: 2, kind: input, shape index: {}]   ;;  %s3889_s3 = inlined_call_operand.vmem [shape: f32[11,220], index: 3, kind: input, shape index: {}]   ;;  %s3890_s4 = inlined_call_operand.vmem [shape: f32[20,220], index: 4, kind: input, shape index: {}]   ;;  %s3891_s5 = inlined_call_operand.vmem [shape: bf16[96,32], index: 5, kind: input, shape index: {}]   ;;  %s3892_s6 = inlined_call_operand.vmem [shape: bf16[160,32], index: 6, kind: input, shape index: {}]   ;;  %s3893_s7 = inlined_call_operand.vmem [shape: bf16[96,32], index: 7, kind: input, shape index: {}]   ;;  %s3894_s8 = inlined_call_operand.vmem [shape: bf16[160,32], index: 8, kind: input, shape index: {}]   ;;  %s3895_s9 = inlined_call_operand.vmem [shape: bf16[3,16,16], index: 9, kind: input, shape index: {}]   ;;  %s3896_s10 = inlined_call_operand.vmem [shape: bf16[3,10,32], index: 10, kind: input, shape index: {}]   ;;  %s3897_s11 = inlined_call_operand.vmem [shape: bf16[3,10,32], index: 11, kind: input, shape index: {}]   ;;  %s3898_s12 = inlined_call_operand.vmem [shape: bf16[3,2,16,16], index: 12, kind: input, shape index: {}]   ;;  %s3899_s13 = inlined_call_operand.vmem [shape: bf16[3,2,32,32], index: 13, kind: input, shape index: {}]   ;;  %s3900_s14 = inlined_call_operand.vmem [shape: bf16[3,16,16], index: 14, kind: input, shape index: {}]   ;;  %s3901_s15 = inlined_call_operand.vmem [shape: bf16[3,32,10], index: 15, kind: input, shape index: {}]   ;;  %s3902_s16 = inlined_call_operand.vmem [shape: f32[2,16,60], index: 16, kind: output, shape index: {}]  }
   0x1   :  { %3903 = sst [smem:[#allocation2_spill]] %s3886_s0 }
   0x2 LB: > { %s2574_s22 = sadd.s32 4294967295, %s3165_s21   ;;  %p2578_p0 = scmp.ge.s32.totalorder %s3165_s21, 1  ;;  %s3165_s21 = sphi %s3260_s21, %s26_s21  }
   0x3   : > { %p462_p1 = scmp.lt.s32.totalorder %s3165_s21, 3 }
   0x5   : > { %p463_p2 = pnand %p2578_p0, %p462_p1 }
   0x6   : > { %p512_p3 = scmp.lt.s32.totalorder (!%p463_p2), %s2574_s22, 1  ;;  %s3904_s26 = sld [smem:[#allocation2_spill]] (!%p463_p2) }
   0x7   : > { %466 = sbr.rel (%p463_p2) target bundleno = 5150 (0x141e), region = 84  ;;  %s3167_s17 = smov (!%p463_p2), 16  }
   0x8   : > { %s3168_s18 = smov (!%p463_p2), 48   ;;  %s3169_s19 = smov (!%p463_p2), 80  }
   0x9   : > { %s3170_s20 = smov (!%p463_p2), 32   ;;  %s3172_s30 = smov (!%p463_p2), 96  }
   0xa   : > { %s3173_s29 = smov (!%p463_p2), 20   ;;  %s3174_s24 = smov (!%p463_p2), 40  }
   0xc   : > { %s3906_s22 = smov (!%p512_p3, %s2574_s22), 1  ;;  %vm538_vm0 = vcmask 1046528   ;;  %vm561_vm1 = vcmask 1044480   ;;  %v2986_v6 = vld [vmem:[%s3893_s7 + $0x28] sm:$0xff]  ;;  %vm549_vm2 = vcmask 1045504   ;;  %v2985_v13 = vld [vmem:[%s3893_s7 + $0x20] sm:$0xff] }
   0xd   : > { %s2979_s23 = sshll.u32 %s3906_s22, 5  ;;  %667 = vmatpush.bf16.msra.mxu0 %v2986_v6  ;;  %vm573_vm3 = vcmask 1043456   ;;  %vm585_vm4 = vcmask 1042432   ;;  %v2984_v50 = vld [vmem:[%s3893_s7 + $0x18] sm:$0xff]  ;;  %v2983_v51 = vld [vmem:[%s3893_s7 + $0x10] sm:$0xff]  ;;  %v3002_v52 = vld [vmem:[%s3891_s5 + $0x28] sm:$0xff] }
   0xe   : > { %s516_s27 = scalar_lea.vmem %s3904_s26, %s2979_s23  ;;  %s3171_s23 = smov 64   ;;  %936 = vmatpush.bf16.msra.mxu3 %v3002_v52  ;;  %v2982_v53 = vld [vmem:[%s3893_s7 + $0x8] sm:$0xff]  ;;  %v3001_v54 = vld [vmem:[%s3891_s5 + $0x20] sm:$0xff]  ;;  %v3000_v56 = vld [vmem:[%s3891_s5 + $0x18] sm:$0xff]  ;;  %vm597_vm5 = vcmask 130048   ;;  %vm600_vm6 = vcmask 261120  }
   0xf   : > { %v3274_v0 = vld [vmem:[%s516_s27] sm:$0xff]  ;;  %v3276_v1 = vld [vmem:[%s516_s27 + $0x8] sm:$0xff]  ;;  %v3278_v2 = vld [vmem:[%s516_s27 + $0x10] sm:$0xff]  ;;  %vm603_vm7 = vcmask 392192   ;;  %vm606_vm8 = vcmask 523264   ;;  %vm609_vm9 = vcmask 654336  }
  0x10   : > { %v3281_v3 = vmul.f32 0.001, %v3274_v0  ;;  %v3284_v4 = vmul.f32 0.001, %v3276_v1  ;;  %v3287_v5 = vmul.f32 0.001, %v3278_v2 }
  0x11   : > { %v3308_v22 = vld [vmem:[%s516_s27 + $0x18] sm:$0x3f]  ;;  %668 = vmatpush.bf16.msra.mxu0 %v2985_v13  ;;  %v2981_v55 = vld [vmem:[%s3893_s7] sm:$0xff]  ;;  %v2999_v57 = vld [vmem:[%s3891_s5 + $0x10] sm:$0xff]  ;;  %vm661_vm10 = vcmask 785408   ;;  %vm1107_vm11 = vcmask 81920  }
  0x12   : > { %v539_v7 = vrot.slane %v3281_v3, 1  ;;  %v540_v8 = vrot.slane %v3284_v4, 1  ;;  %v562_v9 = vrot.slane %v3281_v3, 3  ;;  %v563_v10 = vrot.slane %v3284_v4, 3  ;;  %937 = vmatpush.bf16.msra.mxu3 %v3001_v54  ;;  %v2998_v58 = vld [vmem:[%s3891_s5 + $0x8] sm:$0xff]  ;;  %v2997_v59 = vld [vmem:[%s3891_s5] sm:$0xff] }
  0x13   : > { %v565_v11 = vrot.slane %v3287_v5, 3  ;;  %v550_v12 = vrot.slane %v3281_v3, 2  ;;  %v551_v16 = vrot.slane %v3284_v4, 2  ;;  %v553_v17 = vrot.slane %v3287_v5, 2  ;;  %v3011_v52 = vld [vmem:[%s3892_s6 + $0x40] sm:$0xff]  ;;  %s2980_s25 = sshll.u32 %s3906_s22, 4 }
  0x14   : > { %v541_v14 = vsel %vm538_vm0, %v539_v7, %v540_v8  ;;  %v564_v15 = vsel %vm561_vm1, %v562_v9, %v563_v10  ;;  %v574_v20 = vrot.slane %v3281_v3, 4  ;;  %v575_v21 = vrot.slane %v3284_v4, 4  ;;  %s521_s26 = scalar_lea.vmem %s3902_s16, %s2980_s25 }
  0x15   : > { %v3066_v18 = vpack.i.bf16 %v540_v8, %v541_v14  ;;  %v566_v19 = vsel %vm561_vm1, %v563_v10, %v565_v11  ;;  %v577_v24 = vrot.slane %v3287_v5, 4  ;;  %v586_v25 = vrot.slane %v3281_v3, 5  ;;  %669 = vmatpush.bf16.msra.mxu0 %v2984_v50  ;;  %v2995_v50 = vld [vmem:[%s3894_s8 + $0x40] sm:$0xff] }
  0x16   : > { %v3076_v23 = vpack.i.bf16 %v566_v19, %v564_v15  ;;  %v587_v26 = vrot.slane %v3284_v4, 5  ;;  %v589_v27 = vrot.slane %v3287_v5, 5  ;;  %v552_v28 = vsel %vm549_vm2, %v550_v12, %v551_v16  ;;  %938 = vmatpush.bf16.msra.mxu3 %v3000_v56 }
  0x17   : > { %3067 = vrot.lane.b32.xlu0 %v3066_v18, %s3167_s17  ;;  %v554_v29 = vsel %vm549_vm2, %v551_v16, %v553_v17  ;;  %v3319_v30 = vmul.f32 0.001, %v3308_v22  ;;  %v576_v31 = vsel %vm573_vm3, %v574_v20, %v575_v21  ;;  %v578_v32 = vsel %vm573_vm3, %v575_v21, %v577_v24 }
  0x18   : > { %3077 = vrot.lane.b32.xlu1 %v3076_v23, %s3168_s18  ;;  %v588_v33 = vsel %vm585_vm4, %v586_v25, %v587_v26  ;;  %v590_v34 = vsel %vm585_vm4, %v587_v26, %v589_v27  ;;  %v837_v35 = vrot.slane %v3287_v5, 1  ;;  %v3071_v37 = vpack.i.bf16 %v554_v29, %v552_v28 }
  0x19   : > { %v838_v36 = vrot.slane %v3319_v30, 1  ;;  %v3086_v38 = vpack.i.bf16 %v590_v34, %v588_v33  ;;  %v3081_v39 = vpack.i.bf16 %v578_v32, %v576_v31  ;;  %v846_v40 = vrot.slane %v3319_v30, 2  ;;  %670 = vmatpush.bf16.msra.mxu0 %v2983_v51  ;;  %v3012_v51 = vld [vmem:[%s3892_s6 + $0x48] sm:$0xff] }
  0x1a   : > { %v854_v41 = vrot.slane %v3319_v30, 3  ;;  %v862_v48 = vrot.slane %v3319_v30, 4  ;;  %v866_v49 = vrot.slane %v3319_v30, 5  ;;  %939 = vmatpush.bf16.msra.mxu3 %v2999_v57  ;;  %vm1173_vm12 = vcmask 1041408  }
  0x1b   : > { %3087 = vrot.lane.b32.xlu2 %v3086_v38, %s3169_s19  ;;  %v839_v42 = vsel %vm538_vm0, %v837_v35, %v838_v36  ;;  %v847_v43 = vsel %vm549_vm2, %v553_v17, %v846_v40  ;;  %vm1145_vm13 = vcmask 1040384  }
  0x1c   : > { %v855_v44 = vsel %vm561_vm1, %v565_v11, %v854_v41  ;;  %v3091_v45 = vpack.i.bf16 %v838_v36, %v839_v42  ;;  %v3096_v46 = vpack.i.bf16 %v846_v40, %v847_v43 }
  0x1d   : > { %v3101_v47 = vpack.i.bf16 %v854_v41, %v855_v44  ;;  %671 = vmatpush.bf16.msra.mxu0 %v2982_v53 }
  0x1e   : > { %940 = vmatpush.bf16.msra.mxu3 %v2998_v58 }
  0x1f   : > { %3072 = vrot.lane.b32.xlu0 %v3071_v37, %s3170_s20 }
  0x20   : > { %3082 = vrot.lane.b32.xlu1 %v3081_v39, %s3171_s23 }
  0x21   : > { %672 = vmatpush.bf16.msra.mxu0 %v2981_v55 }
  0x22   : > { %941 = vmatpush.bf16.msra.mxu3 %v2997_v59 }
  0x23   : > { %3092 = vrot.lane.b32.xlu2 %v3091_v45, %s3167_s17 }
  0x25   : > { %1070 = vmatpush.bf16.msrb.mxu0 %v3012_v51 }
  0x27   : > { %3097 = vrot.lane.b32.xlu0 %v3096_v46, %s3170_s20 }
  0x28   : > { %3102 = vrot.lane.b32.xlu1 %v3101_v47, %s3168_s18 }
  0x29   : > { %1071 = vmatpush.bf16.msrb.mxu0 %v3011_v52 }
  0x2b   : > { %863 = vrot.lane.b32.xlu2 %v862_v48, %s3171_s23 }
  0x2f   : > { %867 = vrot.lane.b32.xlu0 %v866_v49, %s3169_s19  ;;  %v2996_v49 = vld [vmem:[%s3894_s8 + $0x48] sm:$0xff] }
  0x30   : > { %826 = vmatpush.bf16.msra.mxu2 %v2996_v49 }
  0x34   : > { %827 = vmatpush.bf16.msra.mxu2 %v2995_v50 }
  0x75   : > { %v3088_v60 = vpop.permute.xlu2 %3087 }
  0x76   : > { %v3090_v7 = vunpack.i.h.bf16 %v3088_v60  ;;  %v3089_v8 = vunpack.i.l.bf16 %v3088_v60 }
  0x7d   : > { %v3093_v15 = vpop.permute.xlu2 %3092 }
  0x7e   : > { %v3095_v25 = vunpack.i.h.bf16 %v3093_v15  ;;  %v3094_v26 = vunpack.i.l.bf16 %v3093_v15 }
  0x80   : > { %v871_v31 = vsel %vm597_vm5, %v3319_v30, %v3095_v25  ;;  %v870_v32 = vsel %vm597_vm5, %v3287_v5, %v3094_v26  ;;  %v2993_v25 = vld [vmem:[%s3894_s8 + $0x30] sm:$0xff]  ;;  %v3010_v26 = vld [vmem:[%s3892_s6 + $0x38] sm:$0xff] }
  0x81   : > { %1051 = vmatpush.bf16.msrb.mxu2 %v3010_v26  ;;  %v1166_v26 = vrot.slane %v3278_v2, 1 }
  0x85   : > { %v864_v39 = vpop.permute.xlu2 %863 }
  0x89   : > { %v3068_v61 = vpop.permute.xlu0 %3067 }
  0x8a   : > { %v3078_v62 = vpop.permute.xlu1 %3077  ;;  %v3070_v63 = vunpack.i.h.bf16 %v3068_v61  ;;  %v3069_v6 = vunpack.i.l.bf16 %v3068_v61 }
  0x8b   : > { %v3080_v10 = vunpack.i.h.bf16 %v3078_v62  ;;  %v3079_v11 = vunpack.i.l.bf16 %v3078_v62 }
  0x8c   : > { %v599_v16 = vsel %vm597_vm5, %v3284_v4, %v3070_v63  ;;  %v598_v17 = vsel %vm597_vm5, %v3281_v3, %v3069_v6 }
  0x91   : > { %v3073_v9 = vpop.permute.xlu0 %3072 }
  0x92   : > { %v3075_v12 = vunpack.i.h.bf16 %v3073_v9  ;;  %v3074_v13 = vunpack.i.l.bf16 %v3073_v9  ;;  %v3083_v14 = vpop.permute.xlu1 %3082 }
  0x93   : > { %v3085_v18 = vunpack.i.h.bf16 %v3083_v14  ;;  %v3084_v19 = vunpack.i.l.bf16 %v3083_v14 }
  0x94   : > { %v601_v20 = vsel %vm600_vm6, %v598_v17, %v3074_v13  ;;  %v602_v21 = vsel %vm600_vm6, %v599_v16, %v3075_v12 }
  0x95   : > { %v604_v23 = vsel %vm603_vm7, %v601_v20, %v3079_v11  ;;  %v605_v24 = vsel %vm603_vm7, %v602_v21, %v3080_v10 }
  0x96   : > { %v607_v27 = vsel %vm606_vm8, %v604_v23, %v3084_v19  ;;  %v608_v4 = vsel %vm606_vm8, %v605_v24, %v3085_v18  ;;  %v2994_v24 = vld [vmem:[%s3894_s8 + $0x38] sm:$0xff] }
  0x97   : > { %v610_v28 = vsel %vm609_vm9, %v607_v27, %v3089_v8  ;;  %v611_v3 = vsel %vm609_vm9, %v608_v4, %v3090_v7  ;;  %806 = vmatpush.bf16.msra.mxu1 %v2994_v24  ;;  %v2992_v27 = vld [vmem:[%s3894_s8 + $0x28] sm:$0xff]  ;;  %v3009_v4 = vld [vmem:[%s3892_s6 + $0x30] sm:$0xff]  ;;  %v1174_v24 = vrot.slane %v3274_v0, 6 }
  0x98   : > { %v612_v29 = vpack.c.bf16 %v611_v3, %v610_v28  ;;  %v2991_v28 = vld [vmem:[%s3894_s8 + $0x20] sm:$0xff]  ;;  %1052 = vmatpush.bf16.msrb.mxu2 %v3009_v4  ;;  %v3008_v3 = vld [vmem:[%s3892_s6 + $0x28] sm:$0xff]  ;;  %v1164_v4 = vrot.slane %v3276_v1, 1 }
  0x99   : > { %v3098_v33 = vpop.permute.xlu0 %3097 }
  0x9a   : > { %v3100_v34 = vunpack.i.h.bf16 %v3098_v33  ;;  %v3099_v35 = vunpack.i.l.bf16 %v3098_v33  ;;  %2607 = vmatmul.msk.bf16.vlgmr.msra.gmra.mxu0 %vm661_vm10, %v612_v29  ;;  %v3103_v36 = vpop.permute.xlu1 %3102  ;;  %v2990_v29 = vld [vmem:[%s3894_s8 + $0x18] sm:$0xff] }
  0x9b   : > { %v3105_v37 = vunpack.i.h.bf16 %v3103_v36  ;;  %v3104_v38 = vunpack.i.l.bf16 %v3103_v36  ;;  %807 = vmatpush.bf16.msra.mxu1 %v2993_v25  ;;  %v3006_v33 = vld [vmem:[%s3892_s6 + $0x18] sm:$0xff]  ;;  %v2987_v36 = vld [vmem:[%s3894_s8] sm:$0xff]  ;;  %v1175_v25 = vrot.slane %v3276_v1, 6 }
  0x9c   : > { %v872_v40 = vsel %vm600_vm6, %v870_v32, %v3099_v35  ;;  %v873_v41 = vsel %vm600_vm6, %v871_v31, %v3100_v34  ;;  %1053 = vmatpush.bf16.msrb.mxu2 %v3008_v3  ;;  %v3007_v31 = vld [vmem:[%s3892_s6 + $0x20] sm:$0xff]  ;;  %v2989_v32 = vld [vmem:[%s3894_s8 + $0x10] sm:$0xff]  ;;  %v2988_v34 = vld [vmem:[%s3894_s8 + $0x8] sm:$0xff] }
  0x9d   : > { %v874_v42 = vsel %vm603_vm7, %v872_v40, %v3104_v38  ;;  %v875_v30 = vsel %vm603_vm7, %v873_v41, %v3105_v37  ;;  %v3005_v35 = vld [vmem:[%s3892_s6 + $0x10] sm:$0xff]  ;;  %v3004_v37 = vld [vmem:[%s3892_s6 + $0x8] sm:$0xff]  ;;  %v3003_v38 = vld [vmem:[%s3892_s6] sm:$0xff]  ;;  %v1176_v3 = vsel %vm1173_vm12, %v1174_v24, %v1175_v25  ;;  %vm1210_vm7 = vcmask 89088  }
  0x9e   : > { %v876_v43 = vsel %vm606_vm8, %v874_v42, %v864_v39  ;;  %v877_v5 = vsel %vm606_vm8, %v875_v30, %v864_v39  ;;  %1286 = vmatpush.msra.mxu0 %v1176_v3  ;;  %v1261_v3 = vld [vmem:[%s3890_s4 + $0x8] sm:$0xff] }
  0x9f   : > { %808 = vmatpush.bf16.msra.mxu1 %v2992_v27  ;;  %v1168_v27 = vrot.slane %v3308_v22, 1 }
  0xa0   : > { %1054 = vmatpush.bf16.msrb.mxu2 %v3007_v31 }
  0xa1   : > { %v868_v44 = vpop.permute.xlu0 %867  ;;  %v1169_v31 = vsel %vm538_vm0, %v1166_v26, %v1168_v27 }
  0xa2   : > { %v878_v45 = vsel %vm609_vm9, %v876_v43, %v868_v44  ;;  %v879_v46 = vsel %vm609_vm9, %v877_v5, %v868_v44  ;;  %1287 = vmatpush.msra.mxu0 %v1169_v31 }
  0xa3   : > { %v880_v47 = vpack.c.bf16 %v879_v46, %v878_v45  ;;  %809 = vmatpush.bf16.msra.mxu1 %v2991_v28  ;;  %v1163_v28 = vrot.slane %v3274_v0, 1 }
  0xa4   : > { %1055 = vmatpush.bf16.msrb.mxu2 %v3006_v33  ;;  %v1167_v33 = vsel %vm538_vm0, %v1164_v4, %v1166_v26 }
  0xa5   : > { %v894_v48 = vrot.slane %v880_v47, 2  ;;  %1288 = vmatpush.msra.mxu0 %v1167_v33  ;;  %v1263_v33 = vld [vmem:[%s3890_s4 + $0x18] sm:$0xff] }
  0xa7   : > { %2673 = vmatmul.msk.bf16.vlgmr.msra.gmra.mxu3 %vm661_vm10, %v894_v48  ;;  %810 = vmatpush.bf16.msra.mxu1 %v2990_v29  ;;  %v3526_v29 = vrot.slane %v3278_v2, 4 }
  0xa8   : > { %1056 = vmatpush.bf16.msrb.mxu2 %v3005_v35  ;;  %v1198_v35 = vrot.slane %v3308_v22, 2 }
  0xab   : > { %811 = vmatpush.bf16.msra.mxu1 %v2989_v32  ;;  %v1165_v32 = vsel %vm538_vm0, %v1163_v28, %v1164_v4 }
  0xac   : > { %1057 = vmatpush.bf16.msrb.mxu2 %v3004_v37  ;;  %v1138_v37 = vrot.slane %v3276_v1, 2 }
  0xaf   : > { %812 = vmatpush.bf16.msra.mxu1 %v2988_v34  ;;  %v1155_v34 = vrot.slane %v3276_v1, 4 }
  0xb0   : > { %1058 = vmatpush.bf16.msrb.mxu2 %v3003_v38  ;;  %v1203_v38 = vsel %vm573_vm3, %v3526_v29, %v1165_v32 }
  0xb1   : > { %1289 = vmatpush.msra.mxu0 %v1203_v38 }
  0xb3   : > { %813 = vmatpush.bf16.msra.mxu1 %v2987_v36  ;;  %v1140_v36 = vrot.slane %v3278_v2, 2 }
 0x117   : > { %v674_v53 = vpop.f32.mrf.mxu0 }
 0x118   : > { %v3408_v54 = vmax.f32 %v674_v53, 0.0 }
 0x11a   : > { %v710_v57 = vrot.slane %v3408_v54, 4  ;;  %v701_v58 = vrot.slane %v3408_v54, 3  ;;  %v692_v59 = vrot.slane %v3408_v54, 2  ;;  %v683_v60 = vrot.slane %v3408_v54, 1 }
 0x11f   : > { %v676_v55 = vpop.f32.mrf.mxu0 }
 0x120   : > { %v3410_v56 = vmax.f32 %v676_v55, 0.0 }
 0x122   : > { %v711_v61 = vrot.slane %v3410_v56, 4  ;;  %v702_v62 = vrot.slane %v3410_v56, 3  ;;  %v693_v63 = vrot.slane %v3410_v56, 2  ;;  %v684_v6 = vrot.slane %v3410_v56, 1 }
 0x124   : > { %v712_v7 = vsel %vm573_vm3, %v710_v57, %v711_v61  ;;  %v703_v8 = vsel %vm561_vm1, %v701_v58, %v702_v62  ;;  %v694_v9 = vsel %vm549_vm2, %v692_v59, %v693_v63  ;;  %v685_v10 = vsel %vm538_vm0, %v683_v60, %v684_v6 }
 0x125   : > { %v722_v11 = vpack.c.bf16 %v711_v61, %v712_v7  ;;  %v3116_v12 = vpack.i.bf16 %v702_v62, %v703_v8  ;;  %v3111_v13 = vpack.i.bf16 %v693_v63, %v694_v9  ;;  %v3106_v14 = vpack.i.bf16 %v684_v6, %v685_v10 }
 0x127   : > { %2648 = vmatmul.msk.bf16.vlgmr.msra.gmra.mxu2 %vm600_vm6, %v722_v11  ;;  %3117 = vrot.lane.b32.xlu0 %v3116_v12, %s3172_s30 }
 0x128   : > { %3112 = vrot.lane.b32.xlu2 %v3111_v13, %s3171_s23  ;;  %3107 = vrot.lane.b32.xlu1 %v3106_v14, %s3170_s20 }
 0x129   : > { %2722 = vmatpush.msk.msra.mxu2 %vm573_vm3, %v1198_v35 }
 0x12a   : > { %v943_v15 = vpop.f32.mrf.mxu3 }
 0x12b   : > { %v3427_v16 = vmax.f32 %v943_v15, 0.0 }
 0x12d   : > { %v957_v17 = vrot.slane %v3427_v16, 3  ;;  %v953_v18 = vrot.slane %v3427_v16, 2  ;;  %v949_v19 = vrot.slane %v3427_v16, 1  ;;  %v961_v20 = vrot.slane %v3427_v16, 4 }
 0x12f   : > { %958 = vrot.lane.b32.xlu0 %v957_v17, %s3172_s30  ;;  %v967_v21 = vpack.c.bf16 %v961_v20, %v961_v20  ;;  %v1209_v20 = vld [vmem:[%s3889_s3 + $0x18] sm:$0x7] }
 0x130   : > { %954 = vrot.lane.b32.xlu2 %v953_v18, %s3171_s23  ;;  %950 = vrot.lane.b32.xlu1 %v949_v19, %s3170_s20  ;;  %v1208_v19 = vld [vmem:[%s3889_s3 + $0x10] sm:$0x7] }
 0x131   : > { %2714 = vmatmul.msk.bf16.vlgmr.msrb.gmra.mxu0 %vm600_vm6, %v967_v21  ;;  %v1206_v21 = vld [vmem:[%s3889_s3] sm:$0xff]  ;;  %2718 = vmatpush.msk.msrb.mxu1 %vm585_vm4, %v1208_v19  ;;  %v1184_v19 = vrot.slane %v3274_v0, 3 }
 0x132   : > { %v945_v23 = vpop.f32.mrf.mxu3 }
 0x133   : > { %v1207_v23 = vld [vmem:[%s3889_s3 + $0x8] sm:$0xff]  ;;  %1235 = vmatpush.msrb.mxu1 %v1206_v21 }
 0x182   : > { %v3113_v39 = vpop.permute.xlu2 %3112 }
 0x183   : > { %v3115_v43 = vunpack.i.h.bf16 %v3113_v39  ;;  %v3114_v5 = vunpack.i.l.bf16 %v3113_v39  ;;  %v1154_v39 = vrot.slane %v3274_v0, 4 }
 0x18a   : > { %v955_v55 = vpop.permute.xlu2 %954 }
 0x199   : > { %v3118_v40 = vpop.permute.xlu0 %3117 }
 0x19a   : > { %v3108_v41 = vpop.permute.xlu1 %3107  ;;  %v3120_v44 = vunpack.i.h.bf16 %v3118_v40  ;;  %v3119_v45 = vunpack.i.l.bf16 %v3118_v40  ;;  %v1132_v40 = vrot.slane %v3278_v2, 5 }
 0x19b   : > { %v3110_v42 = vunpack.i.h.bf16 %v3108_v41  ;;  %v3109_v30 = vunpack.i.l.bf16 %v3108_v41  ;;  %v1194_v41 = vrot.slane %v3308_v22, 5 }
 0x19d   : > { %v716_v46 = vsel %vm600_vm6, %v3410_v56, %v3110_v42  ;;  %v715_v47 = vsel %vm600_vm6, %v3408_v54, %v3109_v30  ;;  %v1147_v42 = vrot.slane %v3276_v1, 7  ;;  %v1199_v30 = vsel %vm549_vm2, %v1140_v36, %v1198_v35 }
 0x19e   : > { %v717_v48 = vsel %vm606_vm8, %v715_v47, %v3114_v5  ;;  %v718_v49 = vsel %vm606_vm8, %v716_v46, %v3115_v43  ;;  %v1158_v43 = vsel %vm573_vm3, %v1155_v34, %v3526_v29  ;;  %v1149_v5 = vrot.slane %v3278_v2, 7  ;;  %1317 = vmatpush.msra.mxu2 %v1199_v30  ;;  %v528_v30 = vld [vmem:[%s3887_s1 + $0x8] sm:$0x3] }
 0x19f   : > { %v719_v50 = vsel %vm661_vm10, %v717_v48, %v3119_v45  ;;  %v720_v51 = vsel %vm661_vm10, %v718_v49, %v3120_v44  ;;  %v1141_v44 = vsel %vm549_vm2, %v1138_v37, %v1140_v36  ;;  %v1130_v45 = vrot.slane %v3276_v1, 5  ;;  %1290 = vmatpush.msra.mxu0 %v1158_v43 }
 0x1a0   : > { %v721_v52 = vpack.c.bf16 %v720_v51, %v719_v50  ;;  %v1156_v46 = vsel %vm573_vm3, %v1154_v39, %v1155_v34  ;;  %v1146_v47 = vrot.slane %v3274_v0, 7  ;;  %v1195_v48 = vsel %vm585_vm4, %v1132_v40, %v1194_v41  ;;  %1318 = vmatpush.msra.mxu2 %v1141_v44  ;;  %v1264_v34 = vld [vmem:[%s3890_s4 + $0x20] sm:$0xf] }
 0x1a1   : > { %v959_v58 = vpop.permute.xlu0 %958  ;;  %v1150_v50 = vsel %vm1145_vm13, %v1147_v42, %v1149_v5  ;;  %v1133_v51 = vsel %vm585_vm4, %v1130_v45, %v1132_v40  ;;  %1291 = vmatpush.msra.mxu0 %v1156_v46  ;;  %v1407_v39 = vrot.slane %v3308_v22, 4  ;;  %v1406_v41 = vperm.slane %v3308_v22, 5 }
 0x1a2   : > { %v951_v53 = vpop.permute.xlu1 %950  ;;  %814 = vmatmul.bf16.vlgmr.msra.gmra.mxu1 %v721_v52  ;;  %1319 = vmatpush.msra.mxu2 %v1195_v48  ;;  %v1148_v52 = vsel %vm1145_vm13, %v1146_v47, %v1147_v42 }
 0x1a3   : > { %v963_v57 = vsel %vm600_vm6, %v3427_v16, %v951_v53  ;;  %v1205_v53 = vsel %vm573_vm3, %v3308_v22, %v1130_v45  ;;  %1292 = vmatpush.msra.mxu0 %v1150_v50  ;;  %v1408_v40 = vsel %vm573_vm3, %v3526_v29, %v1407_v39  ;;  %v1411_v42 = vsel %vm1173_vm12, %v1407_v39, %v1406_v41  ;;  %v527_v29 = vld [vmem:[%s3887_s1] sm:$0xff] }
 0x1a4   : > { %v964_v56 = vsel %vm606_vm8, %v963_v57, %v955_v55  ;;  %1320 = vmatpush.msra.mxu2 %v1133_v51  ;;  %v1202_v55 = vsel %vm573_vm3, %v1140_v36, %v1146_v47  ;;  %v1137_v57 = vrot.slane %v3274_v0, 2  ;;  %1412 = vxpose.xlu2.b32.start [1/3] (short) (narrow) %v1408_v40, 16  ;;  %vm1370_vm8 = vcmask 162816  }
 0x1a5   : > { %v965_v54 = vsel %vm661_vm10, %v964_v56, %v959_v58  ;;  %1293 = vmatpush.msra.mxu0 %v1148_v52  ;;  %2726 = vmatpush.xpose.msk.msra.mxu1 %vm1370_vm8, %v528_v30 }
 0x1a6   : > { %v966_v59 = vpack.c.bf16 %v965_v54, %v965_v54  ;;  %1321 = vmatpush.msra.mxu2 %v1205_v53  ;;  %v1139_v54 = vsel %vm549_vm2, %v1137_v57, %v1138_v37  ;;  %v1265_v37 = vld [vmem:[%s3890_s4 + $0x28] sm:$0xf] }
 0x1a7   : > { %1294 = vmatpush.msra.mxu0 %v1202_v55 }
 0x1a8   : > { %1059 = vmatmul.bf16.vlgmr.msrb.gmra.mxu2 %v966_v59  ;;  %v1129_v59 = vrot.slane %v3274_v0, 5 }
 0x1a9   : > { %1322 = vmatpush.msra.mxu2 %v3278_v2  ;;  %1295 = vmatpush.msra.mxu0 %v1141_v44 }
 0x1aa   : > { %v829_v62 = vpop.f32.mrf.mxu2  ;;  %2727 = vmatpush.xpose.msk.msra.mxu1 %vm1370_vm8, %v527_v29 }
 0x1ab   : > { %1323 = vmatpush.msra.mxu2 %v3276_v1  ;;  %1296 = vmatpush.msra.mxu0 %v1139_v54 }
 0x1ac   : > { %1413 = vxpose.xlu2.b32.cont [2/3] (short) (narrow) %v1411_v42, 16 }
 0x1ad   : > { %1297 = vmatpush.msra.mxu0 %v1133_v51 }
 0x1ae   : > { %v1073_v60 = vpop.f32.mrf.mxu0 }
 0x1b2   : > { %v831_v6 = vpop.f32.mrf.mxu2 }
 0x1b4   : > { %1414 = vxpose.xlu2.b32.end [3/3] (short) (narrow) %v1406_v41, 16 }
 0x1b6   : > { %v1075_v61 = vpop.f32.mrf.mxu0 }
 0x21f   : > { %v815_v63 = vpop.f32.mrf.mxu1 }
 0x220   : > { %v830_v9 = vadd.f32 %v829_v62, %v815_v63 }
 0x222   : > { %v834_v13 = vmax.f32 %v830_v9, 0.0 }
 0x227   : > { %v817_v7 = vpop.f32.mrf.mxu1 }
 0x228   : > { %v832_v8 = vadd.f32 %v831_v6, %v817_v7  ;;  %v1131_v6 = vsel %vm585_vm4, %v1129_v59, %v1130_v45 }
 0x229   : > { %1298 = vmatpush.msra.mxu0 %v1131_v6 }
 0x22a   : > { %v835_v10 = vmax.f32 %v832_v8, 0.0 }
 0x22b   : > { %v1060_v11 = vpop.f32.mrf.mxu2 }
 0x22c   : > { %2715 = vmatpush.xpose.msk.msrb.mxu3 %vm600_vm6, %v835_v10  ;;  %v1074_v12 = vadd.f32 %v1073_v60, %v1060_v11 }
 0x22e   : > { %v1077_v14 = vmax.f32 %v1074_v12, 0.0  ;;  %v1201_v12 = vsel %vm573_vm3, %v3278_v2, %v1129_v59 }
 0x22f   : > { %1299 = vmatpush.msra.mxu0 %v1201_v12 }
 0x230   : > { %2716 = vmatpush.xpose.msk.msrb.mxu3 %vm600_vm6, %v834_v13  ;;  %v1187_v13 = vrot.slane %v3278_v2, 3 }
 0x231   : > { %1300 = vmatpush.msra.mxu0 %v3276_v1 }
 0x233   : > { %v1062_v15 = vpop.f32.mrf.mxu2  ;;  %2717 = vmatmul.msk.f32.vlgmr.msrb.gmra.mxu3 %vm600_vm6, %v1077_v14  ;;  %v1189_v14 = vrot.slane %v3308_v22, 3  ;;  %1301 = vmatpush.msra.mxu0 %v3274_v0  ;;  %v1260_v0 = vld [vmem:[%s3890_s4] sm:$0xff] }
 0x234   : > { %2720 = vmatpush.msk.msra.mxu3 %vm585_vm4, %v1209_v20  ;;  %vm1274_vm4 = vcmask 752640  }
 0x235   : > { %v1190_v15 = vsel %vm561_vm1, %v1187_v13, %v1189_v14 }
 0x236   : > { %1255 = vmatpush.msra.mxu3 %v1207_v23  ;;  %1324 = vmatpush.msra.mxu2 %v1190_v15 }
 0x238   : > { %2730 = vmatpush.xpose.msk.msrb.mxu3 %vm1370_vm8, %v528_v30 }
 0x23c   : > { %2731 = vmatpush.xpose.msk.msrb.mxu3 %vm1370_vm8, %v527_v29 }
 0x23d   : > { %v1428_v50 = vpop.trf.xlu2 }
 0x245   : > { %v1429_v51 = vpop.trf.xlu2 }
 0x2b6   : > { %v1104_v16 = vpop.f32.mrf.mxu3 }
 0x2b7   : > { %v3499_v17 = vadd.f32 1e-15, %v1104_v16  ;;  %v1185_v16 = vrot.slane %v3276_v1, 3  ;;  %v1262_v1 = vld [vmem:[%s3890_s4 + $0x10] sm:$0xff] }
 0x2b9   : > { %v1108_v18 = vsel %vm1107_vm11, %v3499_v17, 0.0  ;;  %v1188_v20 = vsel %vm561_vm1, %v1185_v16, %v1187_v13  ;;  %v1186_v23 = vsel %vm561_vm1, %v1184_v19, %v1185_v16 }
 0x2ba   : > { %1109 = vadd.xlane.f32.xlu1 %v1108_v18  ;;  %v1179_v18 = vrot.slane %v3308_v22, 6  ;;  %1325 = vmatpush.msra.mxu2 %v1188_v20 }
 0x32d   : > { %v1110_v49 = vpop.xlane.xlu1 %1109 }
 0x32e   : > { %3121 = vrcp.f32 %v1110_v49  ;;  %v1122_v61 = vand.u32 2147483648, %v1110_v49  ;;  %v1120_v63 = vand.u32 2147483647, %v1110_v49  ;;  %vm1116_vm15 = vweird.f32 %v1110_v49 }
 0x330   : > { %v1123_v8 = vor.u32 1.1754944e-38, %v1122_v61  ;;  %vm1121_vm2 = vcmp.eq.f32.partialorder %v1120_v63, 8.507059e+37  ;;  %v2747_v61 = vld [vmem:[%s3896_s10] sm:$0xf] }
 0x334   : > { %v3122_v58 = vpop.eup %3121 }
 0x335   : > { %v1112_v56 = vmul.f32 %v3122_v58, %v1110_v49  ;;  %vm1117_vm14 = vweird.f32 %v3122_v58 }
 0x336   : > { %vm1118_vm0 = vmor %vm1116_vm15, %vm1117_vm14 }
 0x337   : > { %v1113_v60 = vsub.f32 1.0, %v1112_v56  ;;  %v3013_v56 = vld [vmem:[%s3895_s9] sm:$0xff] }
 0x339   : > { %v1114_v62 = vmul.f32 %v3122_v58, %v1113_v60 }
 0x33b   : > { %v1115_v7 = vadd.f32 %v3122_v58, %v1114_v62  ;;  %v3014_v62 = vld [vmem:[%s3896_s10] sm:$0x10] }
 0x33c   : > { %v2748_v63 = vor.u32 %v3014_v62, %v2747_v61 }
 0x33d   : > { %v1119_v9 = vsel %vm1118_vm0, %v3122_v58, %v1115_v7 }
 0x33e   : > { %v1124_v10 = vsel %vm1121_vm2, %v1123_v8, %v1119_v9  ;;  %v1554_v6 = vsel %vm561_vm1, %v2748_v63, 0 }
 0x33f   : > { %v1125_v11 = vmul.f32 %v1124_v10, %v3499_v17  ;;  %v1177_v17 = vrot.slane %v3278_v2, 6  ;;  %v2742_v10 = vld [vmem:[%s3897_s11] sm:$0xf] }
 0x341   : > { %2719 = vmatmul.msk.f32.vlgmr.msrb.gmra.mxu1 %vm1210_vm7, %v1125_v11  ;;  %2721 = vmatmul.msk.f32.vlgmr.msra.gmra.mxu3 %vm1210_vm7, %v1125_v11  ;;  %v1180_v21 = vsel %vm1173_vm12, %v1177_v17, %v1179_v18  ;;  %v1178_v26 = vsel %vm1173_vm12, %v1175_v25, %v1177_v17  ;;  %v3015_v11 = vld [vmem:[%s3897_s11] sm:$0x10] }
 0x342   : > { %v1204_v24 = vsel %vm573_vm3, %v1180_v21, %v1186_v23  ;;  %vm1524_vm3 = vcmask 80896   ;;  %v2743_v12 = vor.u32 %v3015_v11, %v2742_v10  ;;  %v3024_v10 = vld [vmem:[%s3901_s15 + $0x8] sm:$0xff]  ;;  %v3023_v11 = vld [vmem:[%s3901_s15] sm:$0xff] }
 0x343   : > { %1326 = vmatpush.msra.mxu2 %v1204_v24 }
 0x344   : > { %v1529_v13 = vsel %vm561_vm1, %v2743_v12, 0  ;;  %v3691_v12 = vld [vmem:[%s3888_s2 + $0x10] sm:$0xf] }
 0x345   : > { %1327 = vmatpush.msra.mxu2 %v1178_v26 }
 0x347   : > { %1563 = vmatpush.bf16.msrb.mxu2 %v1554_v6 }
 0x349   : > { %2732 = vmatmul.msk.f32.vlgmr.msrb.gmra.mxu3 %vm1370_vm8, %v1428_v50 }
 0x351   : > { %2733 = vmatmul.msk.f32.gmra.mxu3 %vm1370_vm8, %v1429_v51 }
 0x3be   : > { %v1237_v2 = vpop.f32.mrf.mxu1 }
 0x3bf   : > { %v1266_v27 = vperm.slane %v1237_v2, 0 }
 0x3c1   : > { %v1268_v4 = vmul.f32 %v1266_v27, %v1260_v0  ;;  %v1270_v32 = vmul.f32 %v1266_v27, %v1262_v1  ;;  %v1272_v36 = vmul.f32 %v1266_v27, %v1264_v34  ;;  %v3016_v0 = vld [vmem:[%s3898_s12] sm:$0xff]  ;;  %v3018_v27 = vld [vmem:[%s3899_s13 + $0x8] sm:$0xff] }
 0x3c2   : > { %1631 = vmatpush.bf16.msrb.mxu0 %v3018_v27  ;;  %v3027_v27 = vld [vmem:[%s3897_s11 + $0x8] sm:$0x10] }
 0x3c3   : > { %1302 = vmatmul.f32.vlgmr.msra.gmra.mxu0 %v1268_v4  ;;  %v3017_v4 = vld [vmem:[%s3899_s13] sm:$0xff] }
 0x3c4   : > { %v1257_v28 = vpop.f32.mrf.mxu3 }
 0x3c5   : > { %v1267_v31 = vperm.slane %v1257_v28, 0 }
 0x3c6   : > { %1632 = vmatpush.bf16.msrb.mxu0 %v3017_v4 }
 0x3c7   : > { %v1269_v25 = vmul.f32 %v1267_v31, %v1261_v3  ;;  %v1271_v35 = vmul.f32 %v1267_v31, %v1263_v33  ;;  %v1273_v38 = vmul.f32 %v1267_v31, %v1265_v37 }
 0x3c9   : > { %2723 = vmatmul.msk.f32.vlgmr.msra.gmra.mxu2 %vm1274_vm4, %v1269_v25 }
 0x3ca   : > { %1769 = vmatpush.bf16.msra.mxu0 %v3024_v10 }
 0x3cb   : > { %1305 = vmatmul.f32.gmra.mxu0 %v1270_v32 }
 0x3cc   : > { %v3617_v55 = vpop.f32.mrf.mxu3 }
 0x3ce   : > { %1770 = vmatpush.bf16.msra.mxu0 %v3023_v11  ;;  %v3031_v11 = vld [vmem:[%s3898_s12 + $0x18] sm:$0xff] }
 0x3d1   : > { %2724 = vmatmul.msk.f32.gmra.mxu2 %vm1274_vm4, %v1271_v35 }
 0x3d3   : > { %1308 = vmatmul.f32.gmra.mxu0 %v1272_v36 }
 0x3d4   : > { %v3619_v57 = vpop.f32.mrf.mxu3 }
 0x3d5   : > { %v1476_v58 = vpack.c.bf16 %v3619_v57, %v3617_v55 }
 0x3d7   : > { %1492 = vmatpush.bf16.msrb.mxu1 %v1476_v58 }
 0x3d9   : > { %2725 = vmatmul.msk.f32.gmra.mxu2 %vm1274_vm4, %v1273_v38 }
 0x440   : > { %v1303_v22 = vpop.f32.mrf.mxu0 }
 0x448   : > { %v1306_v44 = vpop.f32.mrf.mxu0 }
 0x44c   : > { %v1329_v43 = vpop.f32.mrf.mxu2 }
 0x44d   : > { %v1330_v5 = vadd.f32 %v1329_v43, %v1303_v22 }
 0x44f   : > { %1338 = vxpose.xlu0.b32.start [1/3] (short) (narrow) %v1330_v5, 16  ;;  %v3019_v5 = vld [vmem:[%s3898_s12 + $0x8] sm:$0xff] }
 0x450   : > { %v1309_v47 = vpop.f32.mrf.mxu0 }
 0x454   : > { %v1332_v45 = vpop.f32.mrf.mxu2 }
 0x455   : > { %v1333_v46 = vadd.f32 %v1332_v45, %v1306_v44  ;;  %v3021_v44 = vld [vmem:[%s3899_s13 + $0x18] sm:$0xff]  ;;  %v3020_v45 = vld [vmem:[%s3899_s13 + $0x10] sm:$0xff] }
 0x456   : > { %1704 = vmatpush.bf16.msra.mxu2 %v3021_v44 }
 0x457   : > { %1339 = vxpose.xlu0.b32.cont [2/3] (short) (narrow) %v1333_v46, 16 }
 0x45a   : > { %1705 = vmatpush.bf16.msra.mxu2 %v3020_v45  ;;  %v3028_v45 = vld [vmem:[%s3898_s12 + $0x10] sm:$0xff] }
 0x45c   : > { %v1335_v48 = vpop.f32.mrf.mxu2 }
 0x45d   : > { %v1336_v49 = vadd.f32 %v1335_v48, %v1309_v47 }
 0x45f   : > { %1340 = vxpose.xlu0.b32.end [3/3] (short) (narrow) %v1336_v49, 16 }
 0x4f3   : > { %v1354_v52 = vpop.trf.xlu0 }
 0x4f4   : > { %2728 = vmatmul.msk.f32.vlgmr.msra.gmra.mxu1 %vm1370_vm8, %v1354_v52 }
 0x4f5   : > { %1538 = vmatpush.bf16.msra.mxu1 %v1529_v13  ;;  %v3698_v13 = vld [vmem:[%s3888_s2 + $0x8] sm:$0xff] }
 0x4fb   : > { %v1355_v53 = vpop.trf.xlu0 }
 0x4fc   : > { %2729 = vmatmul.msk.f32.gmra.mxu1 %vm1370_vm8, %v1355_v53 }
 0x504   : > { %2738 = vmatmul.msk.bf16.vlgmr.msrb.gmra.mxu1 %vm597_vm5, %v3013_v56 }
 0x571   : > { %v1400_v54 = vpop.f32.mrf.mxu1 }
 0x579   : > { %v1403_v59 = vpop.f32.mrf.mxu1 }
 0x57a   : > { %v3627_v60 = vpack.c.bf16 %v1403_v59, %v1400_v54 }
 0x57c   : > { %1509 = vmatpush.bf16.msra.mxu3 %v3627_v60 }
 0x57f   : > { %2739 = vmatmul.msk.bf16.vlgmr.msra.gmra.mxu3 %vm597_vm5, %v3013_v56 }
 0x581   : > { %v1494_v7 = vpop.f32.mrf.mxu1 }
 0x589   : > { %v1496_v8 = vpop.f32.mrf.mxu1 }
 0x58a   : > { %v1499_v9 = vpack.c.bf16 %v1496_v8, %v1494_v7 }
 0x58c   : > { %2749 = vmatmul.msk.bf16.vlgmr.msrb.gmra.mxu2 %vm1524_vm3, %v1499_v9  ;;  %v3022_v9 = vld [vmem:[%s3900_s14] sm:$0xff] }
 0x602   : > { %v1511_v14 = vpop.f32.mrf.mxu3 }
 0x60a   : > { %v1513_v15 = vpop.f32.mrf.mxu3 }
 0x60b   : > { %v1516_v16 = vpack.c.bf16 %v1513_v15, %v1511_v14 }
 0x60d   : > { %2744 = vmatmul.msk.bf16.vlgmr.msra.gmra.mxu1 %vm1524_vm3, %v1516_v16 }
 0x60f   : > { %v1565_v17 = vpop.f32.mrf.mxu2 }
 0x617   : > { %v1567_v20 = vpop.f32.mrf.mxu2 }
 0x68a   : > { %v1540_v18 = vpop.f32.mrf.mxu1 }
 0x68b   : > { %v1566_v19 = vadd.f32 %v1565_v17, %v1540_v18  ;;  %v3025_v17 = vld [vmem:[%s3895_s9 + $0x8] sm:$0xff]  ;;  %v3709_v18 = vld [vmem:[%s3888_s2] sm:$0xff] }
 0x68d   : > { %3123 = vtanh.f32 %v1566_v19 }
 0x692   : > { %v1542_v21 = vpop.f32.mrf.mxu1 }
 0x693   : > { %v1568_v23 = vadd.f32 %v1567_v20, %v1542_v21  ;;  %v3647_v24 = vpop.eup %3123 }
 0x694   : > { %v1599_v1 = vmul.f32 0.1, %v3647_v24 }
 0x695   : > { %3125 = vtanh.f32 %v1568_v23 }
 0x69b   : > { %v3649_v26 = vpop.eup %3125 }
 0x69c   : > { %v1574_v2 = vpack.c.bf16 %v3649_v26, %v3647_v24  ;;  %v1600_v32 = vmul.f32 0.1, %v3649_v26 }
 0x69e   : > { %1590 = vmatpush.bf16.msrb.mxu3 %v1574_v2 }
 0x6a1   : > { %2754 = vmatmul.msk.bf16.vlgmr.msrb.gmra.mxu3 %vm597_vm5, %v3016_v0 }
 0x724   : > { %v1592_v28 = vpop.f32.mrf.mxu3 }
 0x725   : > { %v1597_v3 = vmul.f32 0.9, %v1592_v28 }
 0x727   : > { %v1601_v33 = vadd.f32 %v1599_v1, %v1597_v3 }
 0x729   : > { %v1603_v38 = vmul.f32 0.5945349, %v1601_v33 }
 0x72c   : > { %v1594_v31 = vpop.f32.mrf.mxu3 }
 0x72d   : > { %v1598_v25 = vmul.f32 0.9, %v1594_v31  ;;  %v2822_v31 = vld [vmem:[%s3896_s10 + $0x8] sm:$0xf] }
 0x72f   : > { %v1602_v34 = vadd.f32 %v1600_v32, %v1598_v25 }
 0x731   : > { %v1605_v35 = vpack.c.bf16 %v1602_v34, %v1601_v33  ;;  %v1604_v41 = vmul.f32 0.5945349, %v1602_v34 }
 0x733   : > { %2763 = vmatmul.msk.bf16.vlgmr.msrb.gmra.mxu0 %vm600_vm6, %v1605_v35 }
 0x7b0   : > { %v1634_v36 = vpop.f32.mrf.mxu0 }
 0x7b1   : > { %v1639_v37 = vmul.f32 0.4054651, %v1634_v36 }
 0x7b3   : > { %v1641_v39 = vadd.f32 %v1639_v37, %v1603_v38 }
 0x7b5   : > { %3127 = vtanh.f32 %v1641_v39 }
 0x7b8   : > { %v1636_v40 = vpop.f32.mrf.mxu0 }
 0x7b9   : > { %v1640_v42 = vmul.f32 0.4054651, %v1636_v40 }
 0x7bb   : > { %v1642_v30 = vadd.f32 %v1640_v42, %v1604_v41  ;;  %v3128_v29 = vpop.eup %3127 }
 0x7bd   : > { %3129 = vtanh.f32 %v1642_v30 }
 0x7c3   : > { %v3130_v22 = vpop.eup %3129 }
 0x7c4   : > { %v1648_v43 = vpack.c.bf16 %v3130_v22, %v3128_v29 }
 0x7c6   : > { %1664 = vmatpush.bf16.msrb.mxu1 %v1648_v43 }
 0x7c9   : > { %2770 = vmatmul.msk.bf16.vlgmr.msrb.gmra.mxu1 %vm597_vm5, %v3019_v5 }
 0x7ca   : > { %2798 = vmatpush.xpose.msk.msra.mxu1 %vm1524_vm3, %v3691_v12 }
 0x7ce   : > { %2799 = vmatpush.xpose.msk.msra.mxu1 %vm1524_vm3, %v3698_v13 }
 0x7d2   : > { %2800 = vmatpush.xpose.msk.msra.mxu1 %vm1524_vm3, %v3709_v18 }
 0x846   : > { %v1666_v46 = vpop.f32.mrf.mxu1 }
 0x847   : > { %v1671_v47 = vmul.f32 0.9, %v1666_v46  ;;  %v3030_v46 = vld [vmem:[%s3899_s13 + $0x28] sm:$0xff] }
 0x849   : > { %v1673_v50 = vadd.f32 %v1671_v47, %v1599_v1  ;;  %v3026_v1 = vld [vmem:[%s3896_s10 + $0x8] sm:$0x10] }
 0x84a   : > { %v2823_v25 = vor.u32 %v3026_v1, %v2822_v31 }
 0x84b   : > { %v1675_v56 = vmul.f32 0.7768564, %v1673_v50 }
 0x84e   : > { %v1668_v48 = vpop.f32.mrf.mxu1 }
 0x84f   : > { %v1672_v49 = vmul.f32 0.9, %v1668_v48 }
 0x851   : > { %v1674_v51 = vadd.f32 %v1672_v49, %v1600_v32  ;;  %v1897_v32 = vsel %vm561_vm1, %v2823_v25, 0 }
 0x852   : > { %1906 = vmatpush.bf16.msrb.mxu1 %v1897_v32 }
 0x853   : > { %v1677_v52 = vpack.c.bf16 %v1674_v51, %v1673_v50  ;;  %v1676_v61 = vmul.f32 0.7768564, %v1674_v51 }
 0x855   : > { %2783 = vmatmul.msk.bf16.vlgmr.msra.gmra.mxu2 %vm600_vm6, %v1677_v52 }
 0x8d8   : > { %v1707_v53 = vpop.f32.mrf.mxu2 }
 0x8d9   : > { %v1712_v58 = vmul.f32 0.22314355, %v1707_v53 }
 0x8db   : > { %v1714_v54 = vadd.f32 %v1712_v58, %v1675_v56 }
 0x8dd   : > { %3131 = vtanh.f32 %v1714_v54 }
 0x8e0   : > { %v1709_v59 = vpop.f32.mrf.mxu2 }
 0x8e1   : > { %v1713_v62 = vmul.f32 0.22314355, %v1709_v59 }
 0x8e3   : > { %v1715_v63 = vadd.f32 %v1713_v62, %v1676_v61  ;;  %v3132_v6 = vpop.eup %3131 }
 0x8e5   : > { %3133 = vtanh.f32 %v1715_v63 }
 0x8eb   : > { %v3134_v7 = vpop.eup %3133 }
 0x8ec   : > { %v1720_v8 = vpack.c.bf16 %v3134_v7, %v3132_v6 }
 0x8ee   : > { %1736 = vmatpush.bf16.msra.mxu3 %v1720_v8 }
 0x8f1   : > { %2788 = vmatmul.msk.bf16.vlgmr.msra.gmra.mxu3 %vm597_vm5, %v3022_v9 }
 0x8f2   : > { %1852 = vmatpush.bf16.msrb.mxu3 %v3627_v60 }
 0x8f6   : > { %1978 = vmatpush.bf16.msra.mxu3 %v3030_v46 }
 0x901   : > { %2812 = vmatmul.msk.bf16.vlgmr.msrb.gmra.mxu3 %vm597_vm5, %v3025_v17 }
 0x974   : > { %v1738_v14 = vpop.f32.mrf.mxu3 }
 0x97c   : > { %v1740_v15 = vpop.f32.mrf.mxu3 }
 0x97d   : > { %v1743_v16 = vpack.c.bf16 %v1740_v15, %v1738_v14  ;;  %v3033_v14 = vld [vmem:[%s3899_s13 + $0x38] sm:$0xff]  ;;  %v3032_v15 = vld [vmem:[%s3899_s13 + $0x30] sm:$0xff] }
 0x97f   : > { %2797 = vmatmul.msk.bf16.vlgmr.msra.gmra.mxu0 %vm600_vm6, %v1743_v16 }
 0x984   : > { %v1854_v0 = vpop.f32.mrf.mxu3 }
 0x98c   : > { %v1856_v28 = vpop.f32.mrf.mxu3 }
 0x98d   : > { %v1859_v3 = vpack.c.bf16 %v1856_v28, %v1854_v0 }
 0x9fc   : > { %v1772_v19 = vpop.f32.mrf.mxu0 }
 0x9fd   : > { %v3715_v20 = vadd.f32 %v1772_v19, %v3617_v55  ;;  %v2817_v55 = vld [vmem:[%s3897_s11 + $0x8] sm:$0xf] }
 0x9ff   : > { %2801 = vmatmul.msk.f32.vlgmr.msra.gmra.mxu1 %vm1524_vm3, %v3715_v20 }
 0xa00   : > { %2051 = vmatpush.bf16.msra.mxu1 %v3033_v14 }
 0xa04   : > { %v1774_v21 = vpop.f32.mrf.mxu0  ;;  %2052 = vmatpush.bf16.msra.mxu1 %v3032_v15 }
 0xa05   : > { %v3720_v23 = vadd.f32 %v1774_v21, %v3619_v57  ;;  %v2818_v57 = vor.u32 %v3027_v27, %v2817_v55 }
 0xa07   : > { %v1818_v2 = vpack.c.bf16 %v3720_v23, %v3715_v20  ;;  %2802 = vmatmul.msk.f32.gmra.mxu1 %vm1524_vm3, %v3720_v23  ;;  %v1872_v4 = vsel %vm561_vm1, %v2818_v57, 0 }
 0xa08   : > { %1881 = vmatpush.bf16.msrb.mxu0 %v1872_v4 }
 0xa09   : > { %1834 = vmatpush.bf16.msrb.mxu2 %v1818_v2 }
 0xa0b   : > { %2819 = vmatmul.msk.bf16.vlgmr.msrb.gmra.mxu0 %vm1524_vm3, %v1859_v3 }
 0xa0c   : > { %2809 = vmatmul.msk.bf16.vlgmr.msrb.gmra.mxu2 %vm597_vm5, %v3025_v17 }
 0xa7c   : > { %v3743_v36 = vpop.f32.mrf.mxu1 }
 0xa84   : > { %v3745_v37 = vpop.f32.mrf.mxu1 }
 0xa88   : > { %v1883_v38 = vpop.f32.mrf.mxu0 }
 0xa8f   : > { %v1836_v33 = vpop.f32.mrf.mxu2 }
 0xa90   : > { %v1885_v41 = vpop.f32.mrf.mxu0 }
 0xa97   : > { %v1838_v34 = vpop.f32.mrf.mxu2 }
 0xa98   : > { %v1841_v35 = vpack.c.bf16 %v1838_v34, %v1836_v33 }
 0xa9a   : > { %2824 = vmatmul.msk.bf16.vlgmr.msrb.gmra.mxu1 %vm1524_vm3, %v1841_v35  ;;  %v3034_v35 = vld [vmem:[%s3900_s14 + $0x8] sm:$0xff] }
 0xb17   : > { %v1908_v39 = vpop.f32.mrf.mxu1 }
 0xb18   : > { %v1909_v40 = vadd.f32 %v1908_v39, %v1883_v38  ;;  %v3036_v38 = vld [vmem:[%s3901_s15 + $0x18] sm:$0xff]  ;;  %v3035_v39 = vld [vmem:[%s3901_s15 + $0x10] sm:$0xff] }
 0xb1a   : > { %3135 = vtanh.f32 %v1909_v40  ;;  %v3037_v40 = vld [vmem:[%s3895_s9 + $0x10] sm:$0xff] }
 0xb1f   : > { %v1910_v42 = vpop.f32.mrf.mxu1 }
 0xb20   : > { %v1911_v30 = vadd.f32 %v1910_v42, %v1885_v41  ;;  %v3136_v29 = vpop.eup %3135 }
 0xb21   : > { %v3748_v43 = vadd.f32 %v3136_v29, %v3647_v24  ;;  %v3029_v24 = vld [vmem:[%s3899_s13 + $0x20] sm:$0xff]  ;;  %v2904_v29 = vld [vmem:[%s3897_s11 + $0x10] sm:$0xf] }
 0xb22   : > { %3137 = vtanh.f32 %v1911_v30  ;;  %1979 = vmatpush.bf16.msra.mxu3 %v3029_v24 }
 0xb23   : > { %v1945_v49 = vmul.f32 0.1, %v3748_v43 }
 0xb26   : > { %2118 = vmatpush.bf16.msrb.mxu3 %v3036_v38 }
 0xb28   : > { %v3138_v22 = vpop.eup %3137 }
 0xb29   : > { %v3751_v5 = vadd.f32 %v3138_v22, %v3649_v26  ;;  %v3039_v22 = vld [vmem:[%s3897_s11 + $0x10] sm:$0x10] }
 0xb2a   : > { %2119 = vmatpush.bf16.msrb.mxu3 %v3035_v39 }
 0xb2b   : > { %v1920_v44 = vpack.c.bf16 %v3751_v5, %v3748_v43  ;;  %v1946_v51 = vmul.f32 0.1, %v3751_v5 }
 0xb2d   : > { %1936 = vmatpush.bf16.msra.mxu2 %v1920_v44  ;;  %v2905_v44 = vor.u32 %v3039_v22, %v2904_v29 }
 0xb30   : > { %2831 = vmatmul.msk.bf16.vlgmr.msra.gmra.mxu2 %vm597_vm5, %v3028_v45  ;;  %v2212_v45 = vsel %vm561_vm1, %v2905_v44, 0 }
 0xbb3   : > { %v1938_v26 = vpop.f32.mrf.mxu2 }
 0xbb4   : > { %v1943_v47 = vmul.f32 0.9, %v1938_v26 }
 0xbb6   : > { %v1947_v52 = vadd.f32 %v1945_v49, %v1943_v47 }
 0xbb8   : > { %v1949_v59 = vmul.f32 0.5945349, %v1947_v52 }
 0xbbb   : > { %v1940_v48 = vpop.f32.mrf.mxu2 }
 0xbbc   : > { %v1944_v50 = vmul.f32 0.9, %v1940_v48 }
 0xbbe   : > { %v1948_v53 = vadd.f32 %v1946_v51, %v1944_v50 }
 0xbc0   : > { %v1951_v58 = vpack.c.bf16 %v1948_v53, %v1947_v52  ;;  %v1950_v63 = vmul.f32 0.5945349, %v1948_v53 }
 0xbc2   : > { %2844 = vmatmul.msk.bf16.vlgmr.msra.gmra.mxu3 %vm600_vm6, %v1951_v58 }
 0xbc3   : > { %2221 = vmatpush.bf16.msra.mxu3 %v2212_v45 }
 0xc45   : > { %v1981_v56 = vpop.f32.mrf.mxu3 }
 0xc46   : > { %v1986_v54 = vmul.f32 0.4054651, %v1981_v56 }
 0xc48   : > { %v1988_v61 = vadd.f32 %v1986_v54, %v1949_v59 }
 0xc4a   : > { %3139 = vtanh.f32 %v1988_v61 }
 0xc4d   : > { %v1983_v62 = vpop.f32.mrf.mxu3 }
 0xc4e   : > { %v1987_v6 = vmul.f32 0.4054651, %v1983_v62 }
 0xc50   : > { %v1989_v7 = vadd.f32 %v1987_v6, %v1950_v63  ;;  %v3140_v8 = vpop.eup %3139 }
 0xc52   : > { %3141 = vtanh.f32 %v1989_v7 }
 0xc58   : > { %v3142_v9 = vpop.eup %3141 }
 0xc59   : > { %v1995_v10 = vpack.c.bf16 %v3142_v9, %v3140_v8 }
 0xc5b   : > { %2011 = vmatpush.bf16.msra.mxu0 %v1995_v10 }
 0xc5e   : > { %2851 = vmatmul.msk.bf16.vlgmr.msra.gmra.mxu0 %vm597_vm5, %v3031_v11 }
 0xc5f   : > { %2885 = vmatpush.xpose.msk.msrb.mxu0 %vm1524_vm3, %v3691_v12 }
 0xc63   : > { %2886 = vmatpush.xpose.msk.msrb.mxu0 %vm1524_vm3, %v3698_v13 }
 0xc67   : > { %2887 = vmatpush.xpose.msk.msrb.mxu0 %vm1524_vm3, %v3709_v18 }
 0xcdb   : > { %v2013_v16 = vpop.f32.mrf.mxu0 }
 0xcdc   : > { %v2018_v17 = vmul.f32 0.9, %v2013_v16  ;;  %v3040_v16 = vld [vmem:[%s3898_s12 + $0x20] sm:$0xff] }
 0xcde   : > { %v2020_v2 = vadd.f32 %v2018_v17, %v1945_v49  ;;  %v3042_v17 = vld [vmem:[%s3899_s13 + $0x48] sm:$0xff] }
 0xce0   : > { %v2022_v4 = vmul.f32 0.7768564, %v2020_v2 }
 0xce3   : > { %v2015_v19 = vpop.f32.mrf.mxu0 }
 0xce4   : > { %v2019_v21 = vmul.f32 0.9, %v2015_v19  ;;  %v3041_v19 = vld [vmem:[%s3899_s13 + $0x40] sm:$0xff] }
 0xce6   : > { %v2021_v0 = vadd.f32 %v2019_v21, %v1946_v51  ;;  %v3038_v51 = vld [vmem:[%s3896_s10 + $0x10] sm:$0x10] }
 0xce8   : > { %v2024_v55 = vpack.c.bf16 %v2021_v0, %v2020_v2  ;;  %v2023_v31 = vmul.f32 0.7768564, %v2021_v0 }
 0xcea   : > { %2864 = vmatmul.msk.bf16.vlgmr.msra.gmra.mxu1 %vm600_vm6, %v2024_v55 }
 0xd67   : > { %v2054_v27 = vpop.f32.mrf.mxu1 }
 0xd68   : > { %v2059_v57 = vmul.f32 0.22314355, %v2054_v27 }
 0xd6a   : > { %v2061_v28 = vadd.f32 %v2059_v57, %v2022_v4 }
 0xd6c   : > { %3143 = vtanh.f32 %v2061_v28 }
 0xd6f   : > { %v2056_v3 = vpop.f32.mrf.mxu1 }
 0xd70   : > { %v2060_v1 = vmul.f32 0.22314355, %v2056_v3 }
 0xd72   : > { %v2062_v25 = vadd.f32 %v2060_v1, %v2023_v31  ;;  %v3144_v32 = vpop.eup %3143 }
 0xd74   : > { %3145 = vtanh.f32 %v2062_v25 }
 0xd7a   : > { %v3146_v33 = vpop.eup %3145 }
 0xd7b   : > { %v2068_v34 = vpack.c.bf16 %v3146_v33, %v3144_v32 }
 0xd7d   : > { %2084 = vmatpush.bf16.msrb.mxu2 %v2068_v34 }
 0xd80   : > { %2871 = vmatmul.msk.bf16.vlgmr.msrb.gmra.mxu2 %vm597_vm5, %v3034_v35 }
 0xd81   : > { %2192 = vmatpush.bf16.msra.mxu2 %v3627_v60 }
 0xd85   : > { %2318 = vmatpush.bf16.msrb.mxu2 %v3042_v17 }
 0xd89   : > { %2319 = vmatpush.bf16.msrb.mxu2 %v3041_v19 }
 0xd90   : > { %2899 = vmatmul.msk.bf16.vlgmr.msra.gmra.mxu2 %vm597_vm5, %v3037_v40 }
 0xe03   : > { %v2086_v41 = vpop.f32.mrf.mxu2 }
 0xe0b   : > { %v2088_v60 = vpop.f32.mrf.mxu2 }
 0xe0c   : > { %v2091_v42 = vpack.c.bf16 %v2088_v60, %v2086_v41  ;;  %v3045_v41 = vld [vmem:[%s3899_s13 + $0x58] sm:$0xff]  ;;  %v3044_v60 = vld [vmem:[%s3899_s13 + $0x50] sm:$0xff] }
 0xe0e   : > { %2884 = vmatmul.msk.bf16.vlgmr.msrb.gmra.mxu3 %vm600_vm6, %v2091_v42 }
 0xe13   : > { %v2194_v30 = vpop.f32.mrf.mxu2 }
 0xe1b   : > { %v2196_v46 = vpop.f32.mrf.mxu2 }
 0xe1c   : > { %v2199_v24 = vpack.c.bf16 %v2196_v46, %v2194_v30 }
 0xe1e   : > { %2906 = vmatmul.msk.bf16.vlgmr.msra.gmra.mxu3 %vm1524_vm3, %v2199_v24 }
 0xe91   : > { %v2121_v26 = vpop.f32.mrf.mxu3 }
 0xe92   : > { %v3810_v47 = vadd.f32 %v2121_v26, %v3715_v20  ;;  %v2909_v20 = vld [vmem:[%s3896_s10 + $0x10] sm:$0xf] }
 0xe93   : > { %v2910_v52 = vor.u32 %v3038_v51, %v2909_v20 }
 0xe94   : > { %2888 = vmatmul.msk.f32.vlgmr.msrb.gmra.mxu0 %vm1524_vm3, %v3810_v47 }
 0xe99   : > { %v2123_v48 = vpop.f32.mrf.mxu3 }
 0xe9a   : > { %v3815_v49 = vadd.f32 %v2123_v48, %v3720_v23  ;;  %v2237_v23 = vsel %vm561_vm1, %v2910_v52, 0  ;;  %vm2513_vm1 = vcmask 326656  }
 0xe9b   : > { %2246 = vmatpush.bf16.msra.mxu0 %v2237_v23 }
 0xe9c   : > { %v2158_v50 = vpack.c.bf16 %v3815_v49, %v3810_v47  ;;  %2889 = vmatmul.msk.f32.gmra.mxu0 %vm1524_vm3, %v3815_v49 }
 0xe9e   : > { %2174 = vmatpush.bf16.msrb.mxu1 %v2158_v50 }
 0xe9f   : > { %2391 = vmatpush.bf16.msrb.mxu0 %v3045_v41 }
 0xea1   : > { %2896 = vmatmul.msk.bf16.vlgmr.msrb.gmra.mxu1 %vm597_vm5, %v3037_v40  ;;  %v2223_v61 = vpop.f32.mrf.mxu3  ;;  %v3043_v40 = vld [vmem:[%s3898_s12 + $0x28] sm:$0xff] }
 0xea3   : > { %2392 = vmatpush.bf16.msrb.mxu0 %v3044_v60 }
 0xea9   : > { %v2225_v6 = vpop.f32.mrf.mxu3 }
 0xf11   : > { %v2149_v53 = vpop.f32.mrf.mxu0 }
 0xf12   : > { %2497 = vrot.lane.b32.xlu1 %v2149_v53, %s3173_s29  ;;  %v3046_v53 = vld [vmem:[%s3900_s14 + $0x10] sm:$0xff] }
 0xf19   : > { %v2152_v58 = vpop.f32.mrf.mxu0 }
 0xf1a   : > { %2499 = vrot.lane.b32.xlu2 %v2152_v58, %s3173_s29  ;;  %v3048_v58 = vld [vmem:[%s3901_s15 + $0x28] sm:$0xff] }
 0xf1b   : > { %2458 = vmatpush.bf16.msra.mxu2 %v3048_v58 }
 0xf1e   : > { %v2176_v56 = vpop.f32.mrf.mxu1 }
 0xf26   : > { %v2178_v54 = vpop.f32.mrf.mxu1 }
 0xf27   : > { %v2181_v59 = vpack.c.bf16 %v2178_v54, %v2176_v56  ;;  %v3047_v56 = vld [vmem:[%s3901_s15 + $0x20] sm:$0xff] }
 0xf28   : > { %2459 = vmatpush.bf16.msra.mxu2 %v3047_v56 }
 0xf29   : > { %2911 = vmatmul.msk.bf16.vlgmr.msra.gmra.mxu0 %vm1524_vm3, %v2181_v59 }
 0xfa6   : > { %v2248_v62 = vpop.f32.mrf.mxu0 }
 0xfa7   : > { %v2249_v63 = vadd.f32 %v2248_v62, %v2223_v61 }
 0xfa9   : > { %3147 = vtanh.f32 %v2249_v63 }
 0xfae   : > { %v2250_v7 = vpop.f32.mrf.mxu0 }
 0xfaf   : > { %v2251_v8 = vadd.f32 %v2250_v7, %v2225_v6  ;;  %v3148_v9 = vpop.eup %3147 }
 0xfb0   : > { %v2255_v11 = vadd.f32 %v3148_v9, %v3748_v43 }
 0xfb1   : > { %3149 = vtanh.f32 %v2251_v8 }
 0xfb2   : > { %v2285_v2 = vmul.f32 0.1, %v2255_v11 }
 0xfb7   : > { %v3150_v10 = vpop.eup %3149 }
 0xfb8   : > { %v2256_v14 = vadd.f32 %v3150_v10, %v3751_v5  ;;  %v2498_v10 = vpop.permute.xlu1 %2497 }
 0xfba   : > { %v2260_v15 = vpack.c.bf16 %v2256_v14, %v2255_v11  ;;  %v2286_v55 = vmul.f32 0.1, %v2256_v14  ;;  %v2500_v14 = vpop.permute.xlu2 %2499 }
 0xfbc   : > { %2276 = vmatpush.bf16.msra.mxu1 %v2260_v15  ;;  %v2512_v15 = vsel %vm1370_vm8, %v3745_v37, %v2500_v14 }
 0xfbf   : > { %2918 = vmatmul.msk.bf16.vlgmr.msra.gmra.mxu1 %vm597_vm5, %v3040_v16 }
0x103c   : > { %v2278_v43 = vpop.f32.mrf.mxu1 }
0x103d   : > { %v2283_v5 = vmul.f32 0.9, %v2278_v43 }
0x103f   : > { %v2287_v27 = vadd.f32 %v2285_v2, %v2283_v5 }
0x1041   : > { %v2289_v31 = vmul.f32 0.5945349, %v2287_v27 }
0x1044   : > { %v2280_v21 = vpop.f32.mrf.mxu1 }
0x1045   : > { %v2284_v0 = vmul.f32 0.9, %v2280_v21 }
0x1047   : > { %v2288_v57 = vadd.f32 %v2286_v55, %v2284_v0 }
0x1049   : > { %v2291_v4 = vpack.c.bf16 %v2288_v57, %v2287_v27  ;;  %v2290_v32 = vmul.f32 0.5945349, %v2288_v57 }
0x104b   : > { %2931 = vmatmul.msk.bf16.vlgmr.msrb.gmra.mxu2 %vm600_vm6, %v2291_v4 }
0x10ce   : > { %v2321_v28 = vpop.f32.mrf.mxu2 }
0x10cf   : > { %v2326_v3 = vmul.f32 0.4054651, %v2321_v28 }
0x10d1   : > { %v2328_v1 = vadd.f32 %v2326_v3, %v2289_v31 }
0x10d3   : > { %3151 = vtanh.f32 %v2328_v1 }
0x10d6   : > { %v2323_v25 = vpop.f32.mrf.mxu2 }
0x10d7   : > { %v2327_v33 = vmul.f32 0.4054651, %v2323_v25 }
0x10d9   : > { %v2329_v34 = vadd.f32 %v2327_v33, %v2290_v32  ;;  %v3152_v35 = vpop.eup %3151 }
0x10db   : > { %3153 = vtanh.f32 %v2329_v34 }
0x10e1   : > { %v3154_v38 = vpop.eup %3153 }
0x10e2   : > { %v2335_v39 = vpack.c.bf16 %v3154_v38, %v3152_v35 }
0x10e4   : > { %2351 = vmatpush.bf16.msrb.mxu3 %v2335_v39 }
0x10e7   : > { %2938 = vmatmul.msk.bf16.vlgmr.msrb.gmra.mxu3 %vm597_vm5, %v3043_v40 }
0x10e8   : > { %2972 = vmatpush.xpose.msk.msra.mxu3 %vm1524_vm3, %v3691_v12 }
0x10ec   : > { %2973 = vmatpush.xpose.msk.msra.mxu3 %vm1524_vm3, %v3698_v13 }
0x10f0   : > { %2974 = vmatpush.xpose.msk.msra.mxu3 %vm1524_vm3, %v3709_v18 }
0x116a   : > { %v2353_v42 = vpop.f32.mrf.mxu3 }
0x116b   : > { %v2358_v12 = vmul.f32 0.9, %v2353_v42 }
0x116d   : > { %v2360_v22 = vadd.f32 %v2358_v12, %v2285_v2 }
0x116f   : > { %v2362_v46 = vmul.f32 0.7768564, %v2360_v22 }
0x1172   : > { %v2355_v30 = vpop.f32.mrf.mxu3 }
0x1173   : > { %v2359_v29 = vmul.f32 0.9, %v2355_v30 }
0x1175   : > { %v2361_v44 = vadd.f32 %v2359_v29, %v2286_v55 }
0x1177   : > { %v2364_v13 = vpack.c.bf16 %v2361_v44, %v2360_v22  ;;  %v2363_v48 = vmul.f32 0.7768564, %v2361_v44 }
0x1179   : > { %2951 = vmatmul.msk.bf16.vlgmr.msrb.gmra.mxu0 %vm600_vm6, %v2364_v13 }
0x11f6   : > { %v2394_v18 = vpop.f32.mrf.mxu0 }
0x11f7   : > { %v2399_v45 = vmul.f32 0.22314355, %v2394_v18 }
0x11f9   : > { %v2401_v24 = vadd.f32 %v2399_v45, %v2362_v46 }
0x11fb   : > { %3155 = vtanh.f32 %v2401_v24 }
0x11fe   : > { %v2396_v26 = vpop.f32.mrf.mxu0 }
0x11ff   : > { %v2400_v50 = vmul.f32 0.22314355, %v2396_v26 }
0x1201   : > { %v2402_v20 = vadd.f32 %v2400_v50, %v2363_v48  ;;  %v3156_v51 = vpop.eup %3155 }
0x1203   : > { %3157 = vtanh.f32 %v2402_v20 }
0x1209   : > { %v3158_v52 = vpop.eup %3157 }
0x120a   : > { %v2408_v23 = vpack.c.bf16 %v3158_v52, %v3156_v51 }
0x120c   : > { %2424 = vmatpush.bf16.msrb.mxu1 %v2408_v23 }
0x120f   : > { %2958 = vmatmul.msk.bf16.vlgmr.msrb.gmra.mxu1 %vm597_vm5, %v3046_v53  ;;  %vm2516_vm5 = vcmask 490496  }
0x128c   : > { %v2426_v54 = vpop.f32.mrf.mxu1 }
0x1294   : > { %v2428_v59 = vpop.f32.mrf.mxu1 }
0x1295   : > { %v2431_v61 = vpack.c.bf16 %v2428_v59, %v2426_v54 }
0x1297   : > { %2971 = vmatmul.msk.bf16.vlgmr.msra.gmra.mxu2 %vm600_vm6, %v2431_v61 }
0x131a   : > { %v2461_v62 = vpop.f32.mrf.mxu2 }
0x131b   : > { %v2462_v63 = vadd.f32 %v2461_v62, %v3810_v47  ;;  %v2511_v47 = vsel %vm1370_vm8, %v3743_v36, %v2498_v10 }
0x131d   : > { %2975 = vmatmul.msk.f32.vlgmr.msra.gmra.mxu3 %vm1524_vm3, %v2462_v63 }
0x1322   : > { %v2463_v6 = vpop.f32.mrf.mxu2 }
0x1323   : > { %v2464_v7 = vadd.f32 %v2463_v6, %v3815_v49 }
0x1325   : > { %2976 = vmatmul.msk.f32.gmra.mxu3 %vm1524_vm3, %v2464_v7 }
0x13a0   : > { %v2489_v8 = vpop.f32.mrf.mxu3 }
0x13a1   : > { %2505 = vrot.lane.b32.xlu0 %v2489_v8, %s3174_s24 }
0x13a8   : > { %v2492_v9 = vpop.f32.mrf.mxu3 }
0x13a9   : > { %2507 = vrot.lane.b32.xlu1 %v2492_v9, %s3174_s24 }
0x1413   : > { %v2506_v11 = vpop.permute.xlu0 %2505 }
0x1414   : > { %v2514_v49 = vsel %vm2513_vm1, %v2511_v47, %v2506_v11 }
0x1415   : > { %2517 = vst.msk [vmem:[%s521_s26] sm:$0xff] %vm2516_vm5, %v2514_v49 }
0x141b   : > { %v2508_v16 = vpop.permute.xlu1 %2507 }
0x141c   : > { %v2515_v17 = vsel %vm2513_vm1, %v2512_v15, %v2508_v16 }
0x141d   : > { %2518 = vst.msk [vmem:[%s521_s26 + $0x8] sm:$0xff] %vm2516_vm5, %v2515_v17 }
0x141e PF: > { %s26_s21 = sadd.s32 1, %s3165_s21  }
0x141f   : > { %p23_p4 = scmp.ge.s32.totalorder %s26_s21, 4  }
0x1421   :  { %25 = sbr.rel (!%p23_p4) target bundleno = 2 (0x2), region = 134 }

</bundles_post_ra>
